<compile_context>
chip_gen: v5e
topology: v5e:2x2
jax: 0.10.0
libtpu: 0.0.40
codegen_flags: <defaults>
</compile_context>

<pallas_src>
import functools

import jax
import jax.numpy as jnp
import numpy as np
from jax.experimental import pallas as pl
from jax.experimental.pallas import tpu as pltpu

NEG_SLOPE = 0.1           # LReLu_neg_slope
WEIGHT_INIT_STD = 1.0
LANE = 128                # lane-dense padding unit


def _round_up(x, m):
    return ((x + m - 1) // m) * m


def _leaky_relu(x, neg_slope):
    return jnp.where(x >= 0, x, neg_slope * x)


def _padded_num_nodes(n):
    """Node-count padding compatible with the SAGE tiling below."""
    if n <= 512:
        return max(_round_up(n, 128), 128)
    return _round_up(n, 512)


def _sage_tiles(n_pad):
    """(tm, tk) tiles for the dense-adjacency matmul.

    Large graphs stream >= 1-2 MiB of bf16 adjacency per grid step (above the
    per-step overhead break-even on every generation) while the double-buffered
    footprint stays ~10 MiB; small graphs use one full-array tile.
    """
    if n_pad <= 512:
        return n_pad, n_pad
    tm = 512                                   # n_pad >= 1024 -> grid[0] >= 2 (v7x megacore)
    if n_pad % 2048 == 0:
        tk = 2048
    elif n_pad % 1024 == 0:
        tk = 1024
    else:
        tk = 512
    return tm, tk


def _sage_vmem_bytes(tm, tk, h_pad, out_pad):
    """Approx. VMEM footprint (bytes) of one SAGE layer call, double-buffered."""
    per_buffer = (tm * tk * 2                                   # adj tile (bf16)
                  + tk * h_pad * 2                              # x neighbour tile (bf16)
                  + tm * h_pad * 2                              # x root tile (bf16)
                  + 2 * h_pad * out_pad * 2 + out_pad * 4       # Wl, Wr (bf16), bl (f32)
                  + tm * out_pad * 4)                           # out tile (<= f32)
    intermediates = tk * out_pad * 6 + tm * out_pad * 8         # xl (f32+bf16), xroot
    acc = tm * out_pad * 4
    return 2 * per_buffer + acc + intermediates


# ---------------- embedding kernel: two Linear + LeakyReLU layers ----------------
def _embed_kernel(neg_slope, x_ref, w1_ref, b1_ref, w2_ref, b2_ref, o_ref):
    x = x_ref[...]
    h = jnp.dot(x, w1_ref[...], preferred_element_type=jnp.float32) + b1_ref[...]
    h = _leaky_relu(h, neg_slope)
    h = jnp.dot(h, w2_ref[...], preferred_element_type=jnp.float32) + b2_ref[...]
    h = _leaky_relu(h, neg_slope)
    o_ref[...] = h.astype(o_ref.dtype)


def embed(x, w1, b1, w2, b2, neg_slope=NEG_SLOPE):
    # Embeddings are tiny ((#objects, <=hidden)); a single ungridded VMEM call
    # is cheaper than tiling.  x_or/x_ex share weights and are concatenated by
    # the caller, so this runs 3x per forward.  Output is bf16 and lane-padded
    # (w2/b2 pre-padded to 128 lanes), so downstream stores are lane-dense.
    n = x.shape[0]
    h_pad = w2.shape[1]
    return pl.pallas_call(
        functools.partial(_embed_kernel, neg_slope),
        out_shape=jax.ShapeDtypeStruct((n, h_pad), jnp.bfloat16),
        in_specs=[pl.BlockSpec(memory_space=pltpu.MemorySpace.VMEM)] * 5,
        out_specs=pl.BlockSpec(memory_space=pltpu.MemorySpace.VMEM),
    )(x, w1, b1, w2, b2)


# ---------------- fused SAGE layer: tiled adj @ (x @ Wl) + (x @ Wr + bl), fused act ----------------
def _sage_kernel(neg_slope, final, adj_ref, xk_ref, xi_ref, wl_ref, wr_ref,
                 bl_ref, o_ref, acc_ref):
    k = pl.program_id(1)

    @pl.when(k == 0)
    def _():
        acc_ref[...] = jnp.zeros_like(acc_ref)

    # Neighbour projection for this k-tile, recomputed per step (negligible
    # next to the adjacency matmul).  Everything bf16 into the MXU, f32 accum.
    xl = jnp.dot(xk_ref[...], wl_ref[...],
                 preferred_element_type=jnp.float32).astype(jnp.bfloat16)
    acc_ref[...] += jnp.dot(adj_ref[...], xl, preferred_element_type=jnp.float32)

    @pl.when(k == pl.num_programs(1) - 1)
    def _():
        xroot = jnp.dot(xi_ref[...], wr_ref[...],
                        preferred_element_type=jnp.float32) + bl_ref[...]
        out = acc_ref[...] + xroot
        if final:
            # sigmoid: exp on the EUP + approx reciprocal (keeps the divide off the VALU)
            out = pl.reciprocal(1.0 + jnp.exp(-out), approx=True)
            out = jnp.minimum(out, 1.0)
        else:
            out = _leaky_relu(out, neg_slope)
        o_ref[...] = out.astype(o_ref.dtype)


def sage_layer(adj, x, wl, wr, bl, *, final, neg_slope=NEG_SLOPE):
    # TODO(synk): for large sparse grids (avg degree ~2-4) add a scalar-prefetch
    # tile-occupancy table so the reduction axis only visits nonzero adj tiles,
    # and store adj as int8 (v5e/v6e) / fp8-e4m3 (v7x) with an in-kernel widen
    # to bf16 to further halve the dominant HBM stream.
    n_pad = adj.shape[0]
    h_pad = x.shape[1]
    out_pad = wl.shape[1]
    tm, tk = _sage_tiles(n_pad)
    grid = (n_pad // tm, n_pad // tk)          # reduction axis last
    out_dtype = jnp.float32 if final else jnp.bfloat16
    vmem_limit = int(min(48 * 1024 * 1024,
                         max(16 * 1024 * 1024,
                             2 * _sage_vmem_bytes(tm, tk, h_pad, out_pad))))
    return pl.pallas_call(
        functools.partial(_sage_kernel, neg_slope, final),
        out_shape=jax.ShapeDtypeStruct((n_pad, out_pad), out_dtype),
        grid_spec=pltpu.PrefetchScalarGridSpec(
            num_scalar_prefetch=0,
            grid=grid,
            in_specs=[
                pl.BlockSpec((tm, tk), lambda i, k: (i, k)),          # adj (bf16)
                pl.BlockSpec((tk, h_pad), lambda i, k: (k, 0)),       # x: neighbour rows
                pl.BlockSpec((tm, h_pad), lambda i, k: (i, 0)),       # x: root rows
                pl.BlockSpec((h_pad, out_pad), lambda i, k: (0, 0)),  # Wl (resident)
                pl.BlockSpec((h_pad, out_pad), lambda i, k: (0, 0)),  # Wr (resident)
                pl.BlockSpec((1, out_pad), lambda i, k: (0, 0)),      # bl (resident)
            ],
            out_specs=pl.BlockSpec((tm, out_pad), lambda i, k: (i, 0)),
            scratch_shapes=[pltpu.VMEM((tm, out_pad), jnp.float32)],
        ),
        compiler_params=pltpu.CompilerParams(
            dimension_semantics=("parallel", "arbitrary"),
            vmem_limit_bytes=vmem_limit,
        ),
    )(adj, x, x, wl, wr, bl)


# ---------------- topology-static adjacency (hoisted out of the forward) ----------------
def build_adjacency(edge_index, object_ptv, n_pad):
    """Dense 'add'-aggregation adjacency, static per grid topology.

    Built once and reused across forwards.  The object_ptv permutation is
    folded into it (rows/cols indexed in embedding-concatenation order), so the
    per-forward x[object_ptv] gather disappears.  Stored in bf16 (edge counts
    are small exact integers) and fed straight into the MXU.
    """
    tgt = object_ptv[edge_index[1]]
    src = object_ptv[edge_index[0]]
    adj = jnp.zeros((n_pad, n_pad), jnp.float32).at[tgt, src].add(1.0)
    return adj.astype(jnp.bfloat16)


# ---------------- one-time parameter preparation (padding / dtype, outside jit) ----------------
def prepare_params(params):
    """Pad / cast parameters once, outside the jitted forward.

    * embedding second-layer output padded to 128 lanes (lane-dense stores;
      padded lanes stay exactly zero because the padded bias is zero),
    * SAGE weights zero-padded to (h_pad, out_pad) and cast to bf16 so the big
      matmuls run the native bf16 MXU path; biases stay f32 (added to the f32
      accumulator).
    """
    hidden = params["gen"][2].shape[1]
    h_pad = max(LANE, _round_up(hidden, LANE))

    def pad_to(a, rows, cols):
        return jnp.pad(a, ((0, rows - a.shape[0]), (0, cols - a.shape[1])))

    prepped = {}
    for name in ("gen", "load", "line"):
        w1, b1, w2, b2 = params[name]
        prepped[name] = (w1, b1, pad_to(w2, w2.shape[0], h_pad), pad_to(b2, 1, h_pad))

    sage = []
    n_layers = len(params["sage"])
    for li, (wl, bl, wr) in enumerate(params["sage"]):
        out_dim = wl.shape[1]
        out_pad = max(LANE, _round_up(out_dim, LANE)) if li == n_layers - 1 else h_pad
        sage.append((pad_to(wl, h_pad, out_pad).astype(jnp.bfloat16),
                     pad_to(bl, 1, out_pad),
                     pad_to(wr, h_pad, out_pad).astype(jnp.bfloat16)))
    prepped["sage"] = sage
    return prepped


# ---------------- full forward ----------------
def gcn_forward(params, x_gen, x_load, x_or, x_ex, adj, object_ptv):
    n = x_gen.shape[0] + x_load.shape[0] + x_or.shape[0] + x_ex.shape[0]
    n_pad = adj.shape[0]

    h_gen = embed(x_gen, *params["gen"])
    h_load = embed(x_load, *params["load"])
    h_line = embed(jnp.concatenate([x_or, x_ex], axis=0), *params["line"])  # shared weights
    x = jnp.concatenate([h_gen, h_load, h_line], axis=0)       # concat order, bf16, lane-padded
    x = jnp.pad(x, ((0, n_pad - n), (0, 0)))                   # pad rows to the tile grid

    n_layers = len(params["sage"])
    for li, (wl, bl, wr) in enumerate(params["sage"]):
        # out = act( adj @ (x @ Wl) + (x @ Wr + bl) )  -- fused into one call
        x = sage_layer(adj, x, wl, wr, bl, final=(li == n_layers - 1))

    out = x[:n, :1]
    return out[object_ptv]    # back to topology order (permutation was folded into adj)


# ---------------- pure-JAX reference (original, un-rewritten semantics) ----------------
def gcn_reference(params, x_gen, x_load, x_or, x_ex, edge_index, object_ptv):
    def emb(x, p):
        w1, b1, w2, b2 = p
        h = _leaky_relu(x @ w1 + b1, NEG_SLOPE)
        return _leaky_relu(h @ w2 + b2, NEG_SLOPE)

    x = jnp.concatenate(
        [emb(x_gen, params["gen"]), emb(x_load, params["load"]),
         emb(x_or, params["line"]), emb(x_ex, params["line"])], axis=0)
    x = x[object_ptv]
    n = x.shape[0]
    adj = jnp.zeros((n, n), jnp.float32).at[edge_index[1], edge_index[0]].add(1.0)
    for wl, bl, wr in params["sage"][:-1]:
        x = _leaky_relu(adj @ x @ wl + bl + x @ wr, NEG_SLOPE)
    wl, bl, wr = params["sage"][-1]
    return jax.nn.sigmoid(adj @ x @ wl + bl + x @ wr)


# ---------------- deterministic parameter init (normal / in_channels, zero bias) ----------------
def init_linear(key, n_in, n_out, std_base):
    w = jax.random.normal(key, (n_out, n_in), jnp.float32) * (std_base / n_in)
    b = jnp.zeros((1, n_out), jnp.float32)
    return w.T, b  # pre-transposed to (in, out)


def make_params(key, n_f_gen, n_f_load, n_f_endpoint, n_hidden, n_layers, std):
    keys = jax.random.split(key, 6 + 2 * n_layers)
    kiter = iter(keys)

    def two_layer(n_in):
        w1, b1 = init_linear(next(kiter), n_in, n_hidden, std)
        w2, b2 = init_linear(next(kiter), n_hidden, n_hidden, std)
        return (w1, b1, w2, b2)

    params = {
        "gen": two_layer(n_f_gen),
        "load": two_layer(n_f_load),
        "line": two_layer(n_f_endpoint),
        "sage": [],
    }
    for i in range(n_layers):
        n_out = n_hidden if i < n_layers - 1 else 1
        wl, bl = init_linear(next(kiter), n_hidden, n_out, std)   # lin_l (neighbours, +bias)
        wr, _ = init_linear(next(kiter), n_hidden, n_out, std)    # lin_r (root, no bias)
        params["sage"].append((wl, bl, wr))
    return params


if __name__ == "__main__":
    key = jax.random.PRNGKey(0)

    # small synthetic problem
    N_f_gen, N_f_load, N_f_endpoint = 3, 3, 5
    N_node_hidden = 32
    N_GCN_layers = 3
    n_gen, n_load, n_line = 4, 4, 6
    N = n_gen + n_load + 2 * n_line  # 20 objects

    k_par, k_g, k_l, k_o, k_e, k_p = jax.random.split(key, 6)
    params = make_params(k_par, N_f_gen, N_f_load, N_f_endpoint,
                         N_node_hidden, N_GCN_layers, WEIGHT_INIT_STD)
    kparams = prepare_params(params)          # padded / bf16 weights, built once

    x_gen = jax.random.normal(k_g, (n_gen, N_f_gen), jnp.float32)
    x_load = jax.random.normal(k_l, (n_load, N_f_load), jnp.float32)
    x_or = jax.random.normal(k_o, (n_line, N_f_endpoint), jnp.float32)
    x_ex = jax.random.normal(k_e, (n_line, N_f_endpoint), jnp.float32)

    # symmetric ring graph over the topology vector
    src = np.arange(N, dtype=np.int32)
    dst = (src + 1) % N
    edge_index = jnp.asarray(
        np.stack([np.concatenate([src, dst]), np.concatenate([dst, src])]), jnp.int32)
    object_ptv = jax.random.permutation(k_p, N).astype(jnp.int32)

    # static per topology: build once, reuse across forwards
    n_pad = _padded_num_nodes(N)
    adj = build_adjacency(edge_index, object_ptv, n_pad)

    fwd = jax.jit(gcn_forward)
    out = jax.block_until_ready(fwd(kparams, x_gen, x_load, x_or, x_ex, adj, object_ptv))

    ref = gcn_reference(params, x_gen, x_load, x_or, x_ex, edge_index, object_ptv)
    np.testing.assert_allclose(np.asarray(out), np.asarray(ref), rtol=2e-2, atol=2e-3)
    assert out.shape == (N, 1)
    o = np.asarray(out)
    assert np.all(np.isfinite(o)) and np.all((o >= 0.0) & (o <= 1.0))

    print("KERNEL_OK")
</pallas_src>

<mosaic_0001>
module attributes {stable_mosaic.version = 11 : i64} {
  func.func @_embed_kernel(%arg0: memref<4x3xf32, #tpu.memory_space<vmem>>, %arg1: memref<3x32xf32, #tpu.memory_space<vmem>>, %arg2: memref<1x32xf32, #tpu.memory_space<vmem>>, %arg3: memref<32x128xf32, #tpu.memory_space<vmem>>, %arg4: memref<1x128xf32, #tpu.memory_space<vmem>>, %arg5: memref<4x128xbf16, #tpu.memory_space<vmem>>) attributes {dimension_semantics = [], scalar_prefetch = 0 : i64, scratch_operands = 0 : i64, tpu.core_type = #tpu.core_type<tc>} {
    %c0 = arith.constant 0 : index
    %c0_0 = arith.constant 0 : index
    %0 = vector.load %arg0[%c0, %c0_0] : memref<4x3xf32, #tpu.memory_space<vmem>>, vector<4x3xf32>
    %c0_1 = arith.constant 0 : index
    %c0_2 = arith.constant 0 : index
    %1 = vector.load %arg1[%c0_1, %c0_2] : memref<3x32xf32, #tpu.memory_space<vmem>>, vector<3x32xf32>
    %cst = arith.constant dense<0.000000e+00> : vector<4x32xf32>
    %2 = tpu.matmul %0, %1, %cst {dimension_numbers = #tpu.dot_dimension_numbers<[1], [0], [0], [1], [0, 0, 1, 1], [], []>} : vector<4x3xf32>, vector<3x32xf32>, vector<4x32xf32> -> vector<4x32xf32>
    %c0_3 = arith.constant 0 : index
    %c0_4 = arith.constant 0 : index
    %3 = vector.load %arg2[%c0_3, %c0_4] : memref<1x32xf32, #tpu.memory_space<vmem>>, vector<1x32xf32>
    %4 = vector.broadcast %3 : vector<1x32xf32> to vector<4x32xf32>
    %5 = arith.addf %2, %4 : vector<4x32xf32>
    %cst_5 = arith.constant 0.000000e+00 : f32
    %6 = vector.broadcast %cst_5 : f32 to vector<4x32xf32>
    %7 = arith.cmpf oge, %5, %6 : vector<4x32xf32>
    %cst_6 = arith.constant 1.000000e-01 : f32
    %8 = vector.broadcast %cst_6 : f32 to vector<4x32xf32>
    %9 = arith.mulf %8, %5 : vector<4x32xf32>
    %10 = arith.select %7, %5, %9 : vector<4x32xi1>, vector<4x32xf32>
    %c0_7 = arith.constant 0 : index
    %c0_8 = arith.constant 0 : index
    %11 = vector.load %arg3[%c0_7, %c0_8] : memref<32x128xf32, #tpu.memory_space<vmem>>, vector<32x128xf32>
    %cst_9 = arith.constant dense<0.000000e+00> : vector<4x128xf32>
    %12 = tpu.matmul %10, %11, %cst_9 {dimension_numbers = #tpu.dot_dimension_numbers<[1], [0], [0], [1], [0, 0, 1, 1], [], []>} : vector<4x32xf32>, vector<32x128xf32>, vector<4x128xf32> -> vector<4x128xf32>
    %c0_10 = arith.constant 0 : index
    %c0_11 = arith.constant 0 : index
    %13 = vector.load %arg4[%c0_10, %c0_11] : memref<1x128xf32, #tpu.memory_space<vmem>>, vector<1x128xf32>
    %14 = vector.broadcast %13 : vector<1x128xf32> to vector<4x128xf32>
    %15 = arith.addf %12, %14 : vector<4x128xf32>
    %cst_12 = arith.constant 0.000000e+00 : f32
    %16 = vector.broadcast %cst_12 : f32 to vector<4x128xf32>
    %17 = arith.cmpf oge, %15, %16 : vector<4x128xf32>
    %cst_13 = arith.constant 1.000000e-01 : f32
    %18 = vector.broadcast %cst_13 : f32 to vector<4x128xf32>
    %19 = arith.mulf %18, %15 : vector<4x128xf32>
    %20 = arith.select %17, %15, %19 : vector<4x128xi1>, vector<4x128xf32>
    %21 = arith.truncf %20 : vector<4x128xf32> to vector<4x128xbf16>
    %c0_14 = arith.constant 0 : index
    %c0_15 = arith.constant 0 : index
    %22 = vector.load %arg5[%c0_14, %c0_15] : memref<4x128xbf16, #tpu.memory_space<vmem>>, vector<4x128xbf16>
    tpu.vector_store %arg5[%c0_14, %c0_15], %21 {strides = array<i32>} : memref<4x128xbf16, #tpu.memory_space<vmem>>, vector<4x128xbf16>,
    return
  }
}

module attributes {stable_mosaic.version = 11 : i64} {
  func.func @_embed_kernel(%arg0: memref<12x5xf32, #tpu.memory_space<vmem>>, %arg1: memref<5x32xf32, #tpu.memory_space<vmem>>, %arg2: memref<1x32xf32, #tpu.memory_space<vmem>>, %arg3: memref<32x128xf32, #tpu.memory_space<vmem>>, %arg4: memref<1x128xf32, #tpu.memory_space<vmem>>, %arg5: memref<12x128xbf16, #tpu.memory_space<vmem>>) attributes {dimension_semantics = [], scalar_prefetch = 0 : i64, scratch_operands = 0 : i64, tpu.core_type = #tpu.core_type<tc>} {
    %c0 = arith.constant 0 : index
    %c0_0 = arith.constant 0 : index
    %0 = vector.load %arg0[%c0, %c0_0] : memref<12x5xf32, #tpu.memory_space<vmem>>, vector<12x5xf32>
    %c0_1 = arith.constant 0 : index
    %c0_2 = arith.constant 0 : index
    %1 = vector.load %arg1[%c0_1, %c0_2] : memref<5x32xf32, #tpu.memory_space<vmem>>, vector<5x32xf32>
    %cst = arith.constant dense<0.000000e+00> : vector<12x32xf32>
    %2 = tpu.matmul %0, %1, %cst {dimension_numbers = #tpu.dot_dimension_numbers<[1], [0], [0], [1], [0, 0, 1, 1], [], []>} : vector<12x5xf32>, vector<5x32xf32>, vector<12x32xf32> -> vector<12x32xf32>
    %c0_3 = arith.constant 0 : index
    %c0_4 = arith.constant 0 : index
    %3 = vector.load %arg2[%c0_3, %c0_4] : memref<1x32xf32, #tpu.memory_space<vmem>>, vector<1x32xf32>
    %4 = vector.broadcast %3 : vector<1x32xf32> to vector<12x32xf32>
    %5 = arith.addf %2, %4 : vector<12x32xf32>
    %cst_5 = arith.constant 0.000000e+00 : f32
    %6 = vector.broadcast %cst_5 : f32 to vector<12x32xf32>
    %7 = arith.cmpf oge, %5, %6 : vector<12x32xf32>
    %cst_6 = arith.constant 1.000000e-01 : f32
    %8 = vector.broadcast %cst_6 : f32 to vector<12x32xf32>
    %9 = arith.mulf %8, %5 : vector<12x32xf32>
    %10 = arith.select %7, %5, %9 : vector<12x32xi1>, vector<12x32xf32>
    %c0_7 = arith.constant 0 : index
    %c0_8 = arith.constant 0 : index
    %11 = vector.load %arg3[%c0_7, %c0_8] : memref<32x128xf32, #tpu.memory_space<vmem>>, vector<32x128xf32>
    %cst_9 = arith.constant dense<0.000000e+00> : vector<12x128xf32>
    %12 = tpu.matmul %10, %11, %cst_9 {dimension_numbers = #tpu.dot_dimension_numbers<[1], [0], [0], [1], [0, 0, 1, 1], [], []>} : vector<12x32xf32>, vector<32x128xf32>, vector<12x128xf32> -> vector<12x128xf32>
    %c0_10 = arith.constant 0 : index
    %c0_11 = arith.constant 0 : index
    %13 = vector.load %arg4[%c0_10, %c0_11] : memref<1x128xf32, #tpu.memory_space<vmem>>, vector<1x128xf32>
    %14 = vector.broadcast %13 : vector<1x128xf32> to vector<12x128xf32>
    %15 = arith.addf %12, %14 : vector<12x128xf32>
    %cst_12 = arith.constant 0.000000e+00 : f32
    %16 = vector.broadcast %cst_12 : f32 to vector<12x128xf32>
    %17 = arith.cmpf oge, %15, %16 : vector<12x128xf32>
    %cst_13 = arith.constant 1.000000e-01 : f32
    %18 = vector.broadcast %cst_13 : f32 to vector<12x128xf32>
    %19 = arith.mulf %18, %15 : vector<12x128xf32>
    %20 = arith.select %17, %15, %19 : vector<12x128xi1>, vector<12x128xf32>
    %21 = arith.truncf %20 : vector<12x128xf32> to vector<12x128xbf16>
    %c0_14 = arith.constant 0 : index
    %c0_15 = arith.constant 0 : index
    %22 = vector.load %arg5[%c0_14, %c0_15] : memref<12x128xbf16, #tpu.memory_space<vmem>>, vector<12x128xbf16>
    tpu.vector_store %arg5[%c0_14, %c0_15], %21 {strides = array<i32>} : memref<12x128xbf16, #tpu.memory_space<vmem>>, vector<12x128xbf16>,
    return
  }
}

module attributes {stable_mosaic.version = 11 : i64} {
  func.func @_sage_kernel(%arg0: i32, %arg1: i32, %arg2: memref<128x128xbf16, #tpu.memory_space<vmem>>, %arg3: memref<128x128xbf16, #tpu.memory_space<vmem>>, %arg4: memref<128x128xbf16, #tpu.memory_space<vmem>>, %arg5: memref<128x128xbf16, #tpu.memory_space<vmem>>, %arg6: memref<128x128xbf16, #tpu.memory_space<vmem>>, %arg7: memref<1x128xf32, #tpu.memory_space<vmem>>, %arg8: memref<128x128xbf16, #tpu.memory_space<vmem>>, %arg9: memref<128x128xf32, #tpu.memory_space<vmem>>) attributes {dimension_semantics = [#tpu.dimension_semantics<parallel>, #tpu.dimension_semantics<arbitrary>], iteration_bounds = array<i64: 1, 1>, scalar_prefetch = 0 : i64, scratch_operands = 1 : i64, tpu.core_type = #tpu.core_type<tc>, window_params = [{transform_indices = @transform_0, window_bounds = array<i64: 128, 128>}, {transform_indices = @transform_1, window_bounds = array<i64: 128, 128>}, {transform_indices = @transform_2, window_bounds = array<i64: 128, 128>}, {pipeline_mode = #tpu.pipeline_mode<synchronous>, transform_indices = @transform_3, window_bounds = array<i64: 128, 128>}, {pipeline_mode = #tpu.pipeline_mode<synchronous>, transform_indices = @transform_4, window_bounds = array<i64: 128, 128>}, {pipeline_mode = #tpu.pipeline_mode<synchronous>, transform_indices = @transform_5, window_bounds = array<i64: 1, 128>}, {transform_indices = @transform_6, window_bounds = array<i64: 128, 128>}]} {
    %c0_i32 = arith.constant 0 : i32
    %0 = arith.cmpi eq, %arg1, %c0_i32 : i32
    %1 = arith.extui %0 : i1 to i32
    %c0_i32_0 = arith.constant 0 : i32
    %2 = arith.cmpi ne, %1, %c0_i32_0 : i32
    scf.if %2 {
      %cst_13 = arith.constant 0.000000e+00 : f32
      %15 = vector.broadcast %cst_13 : f32 to vector<128x128xf32>
      %c0_14 = arith.constant 0 : index
      %c0_15 = arith.constant 0 : index
      %16 = vector.load %arg9[%c0_14, %c0_15] : memref<128x128xf32, #tpu.memory_space<vmem>>, vector<128x128xf32>
      tpu.vector_store %arg9[%c0_14, %c0_15], %15 {strides = array<i32>} : memref<128x128xf32, #tpu.memory_space<vmem>>, vector<128x128xf32>,
    } else {
    }
    %c0 = arith.constant 0 : index
    %c0_1 = arith.constant 0 : index
    %3 = vector.load %arg3[%c0, %c0_1] : memref<128x128xbf16, #tpu.memory_space<vmem>>, vector<128x128xbf16>
    %c0_2 = arith.constant 0 : index
    %c0_3 = arith.constant 0 : index
    %4 = vector.load %arg5[%c0_2, %c0_3] : memref<128x128xbf16, #tpu.memory_space<vmem>>, vector<128x128xbf16>
    %cst = arith.constant dense<0.000000e+00> : vector<128x128xf32>
    %5 = tpu.matmul %3, %4, %cst {dimension_numbers = #tpu.dot_dimension_numbers<[1], [0], [0], [1], [0, 0, 1, 1], [], []>} : vector<128x128xbf16>, vector<128x128xbf16>, vector<128x128xf32> -> vector<128x128xf32>
    %6 = arith.truncf %5 : vector<128x128xf32> to vector<128x128xbf16>
    %c0_4 = arith.constant 0 : index
    %c0_5 = arith.constant 0 : index
    %7 = vector.load %arg9[%c0_4, %c0_5] : memref<128x128xf32, #tpu.memory_space<vmem>>, vector<128x128xf32>
    %c0_6 = arith.constant 0 : index
    %c0_7 = arith.constant 0 : index
    %8 = vector.load %arg2[%c0_6, %c0_7] : memref<128x128xbf16, #tpu.memory_space<vmem>>, vector<128x128xbf16>
    %cst_8 = arith.constant dense<0.000000e+00> : vector<128x128xf32>
    %9 = tpu.matmul %8, %6, %cst_8 {dimension_numbers = #tpu.dot_dimension_numbers<[1], [0], [0], [1], [0, 0, 1, 1], [], []>} : vector<128x128xbf16>, vector<128x128xbf16>, vector<128x128xf32> -> vector<128x128xf32>
    %10 = arith.addf %7, %9 : vector<128x128xf32>
    %c0_9 = arith.constant 0 : index
    %c0_10 = arith.constant 0 : index
    %11 = vector.load %arg9[%c0_9, %c0_10] : memref<128x128xf32, #tpu.memory_space<vmem>>, vector<128x128xf32>
    tpu.vector_store %arg9[%c0_9, %c0_10], %10 {strides = array<i32>} : memref<128x128xf32, #tpu.memory_space<vmem>>, vector<128x128xf32>,
    %c0_i32_11 = arith.constant 0 : i32
    %12 = arith.cmpi eq, %arg1, %c0_i32_11 : i32
    %13 = arith.extui %12 : i1 to i32
    %c0_i32_12 = arith.constant 0 : i32
    %14 = arith.cmpi ne, %13, %c0_i32_12 : i32
    scf.if %14 {
      %c0_13 = arith.constant 0 : index
      %c0_14 = arith.constant 0 : index
      %15 = vector.load %arg4[%c0_13, %c0_14] : memref<128x128xbf16, #tpu.memory_space<vmem>>, vector<128x128xbf16>
      %c0_15 = arith.constant 0 : index
      %c0_16 = arith.constant 0 : index
      %16 = vector.load %arg6[%c0_15, %c0_16] : memref<128x128xbf16, #tpu.memory_space<vmem>>, vector<128x128xbf16>
      %cst_17 = arith.constant dense<0.000000e+00> : vector<128x128xf32>
      %17 = tpu.matmul %15, %16, %cst_17 {dimension_numbers = #tpu.dot_dimension_numbers<[1], [0], [0], [1], [0, 0, 1, 1], [], []>} : vector<128x128xbf16>, vector<128x128xbf16>, vector<128x128xf32> -> vector<128x128xf32>
      %c0_18 = arith.constant 0 : index
      %c0_19 = arith.constant 0 : index
      %18 = vector.load %arg7[%c0_18, %c0_19] : memref<1x128xf32, #tpu.memory_space<vmem>>, vector<1x128xf32>
      %19 = vector.broadcast %18 : vector<1x128xf32> to vector<128x128xf32>
      %20 = arith.addf %17, %19 : vector<128x128xf32>
      %c0_20 = arith.constant 0 : index
      %c0_21 = arith.constant 0 : index
      %21 = vector.load %arg9[%c0_20, %c0_21] : memref<128x128xf32, #tpu.memory_space<vmem>>, vector<128x128xf32>
      %22 = arith.addf %21, %20 : vector<128x128xf32>
      %cst_22 = arith.constant 0.000000e+00 : f32
      %23 = vector.broadcast %cst_22 : f32 to vector<128x128xf32>
      %24 = arith.cmpf oge, %22, %23 : vector<128x128xf32>
      %cst_23 = arith.constant 1.000000e-01 : f32
      %25 = vector.broadcast %cst_23 : f32 to vector<128x128xf32>
      %26 = arith.mulf %25, %22 : vector<128x128xf32>
      %27 = arith.select %24, %22, %26 : vector<128x128xi1>, vector<128x128xf32>
      %28 = arith.truncf %27 : vector<128x128xf32> to vector<128x128xbf16>
      %c0_24 = arith.constant 0 : index
      %c0_25 = arith.constant 0 : index
      %29 = vector.load %arg8[%c0_24, %c0_25] : memref<128x128xbf16, #tpu.memory_space<vmem>>, vector<128x128xbf16>
      tpu.vector_store %arg8[%c0_24, %c0_25], %28 {strides = array<i32>} : memref<128x128xbf16, #tpu.memory_space<vmem>>, vector<128x128xbf16>,
    } else {
    }
    return
  }
  func.func @transform_0(%arg0: i32, %arg1: i32) -> (i32, i32) {
    %c0_i32 = arith.constant 0 : i32
    return %arg0, %arg1 : i32, i32
  }
  func.func @transform_1(%arg0: i32, %arg1: i32) -> (i32, i32) {
    %c0_i32 = arith.constant 0 : i32
    %c0_i32_0 = arith.constant 0 : i32
    return %arg1, %c0_i32 : i32, i32
  }
  func.func @transform_2(%arg0: i32, %arg1: i32) -> (i32, i32) {
    %c0_i32 = arith.constant 0 : i32
    %c0_i32_0 = arith.constant 0 : i32
    return %arg0, %c0_i32 : i32, i32
  }
  func.func @transform_3(%arg0: i32, %arg1: i32) -> (i32, i32) {
    %c0_i32 = arith.constant 0 : i32
    %c0_i32_0 = arith.constant 0 : i32
    %c0_i32_1 = arith.constant 0 : i32
    return %c0_i32, %c0_i32_0 : i32, i32
  }
  func.func @transform_4(%arg0: i32, %arg1: i32) -> (i32, i32) {
    %c0_i32 = arith.constant 0 : i32
    %c0_i32_0 = arith.constant 0 : i32
    %c0_i32_1 = arith.constant 0 : i32
    return %c0_i32, %c0_i32_0 : i32, i32
  }
  func.func @transform_5(%arg0: i32, %arg1: i32) -> (i32, i32) {
    %c0_i32 = arith.constant 0 : i32
    %c0_i32_0 = arith.constant 0 : i32
    %c0_i32_1 = arith.constant 0 : i32
    return %c0_i32, %c0_i32_0 : i32, i32
  }
  func.func @transform_6(%arg0: i32, %arg1: i32) -> (i32, i32) {
    %c0_i32 = arith.constant 0 : i32
    %c0_i32_0 = arith.constant 0 : i32
    return %arg0, %c0_i32 : i32, i32
  }
}

module attributes {stable_mosaic.version = 11 : i64} {
  func.func @_sage_kernel(%arg0: i32, %arg1: i32, %arg2: memref<128x128xbf16, #tpu.memory_space<vmem>>, %arg3: memref<128x128xbf16, #tpu.memory_space<vmem>>, %arg4: memref<128x128xbf16, #tpu.memory_space<vmem>>, %arg5: memref<128x128xbf16, #tpu.memory_space<vmem>>, %arg6: memref<128x128xbf16, #tpu.memory_space<vmem>>, %arg7: memref<1x128xf32, #tpu.memory_space<vmem>>, %arg8: memref<128x128xbf16, #tpu.memory_space<vmem>>, %arg9: memref<128x128xf32, #tpu.memory_space<vmem>>) attributes {dimension_semantics = [#tpu.dimension_semantics<parallel>, #tpu.dimension_semantics<arbitrary>], iteration_bounds = array<i64: 1, 1>, scalar_prefetch = 0 : i64, scratch_operands = 1 : i64, tpu.core_type = #tpu.core_type<tc>, window_params = [{transform_indices = @transform_0, window_bounds = array<i64: 128, 128>}, {transform_indices = @transform_1, window_bounds = array<i64: 128, 128>}, {transform_indices = @transform_2, window_bounds = array<i64: 128, 128>}, {pipeline_mode = #tpu.pipeline_mode<synchronous>, transform_indices = @transform_3, window_bounds = array<i64: 128, 128>}, {pipeline_mode = #tpu.pipeline_mode<synchronous>, transform_indices = @transform_4, window_bounds = array<i64: 128, 128>}, {pipeline_mode = #tpu.pipeline_mode<synchronous>, transform_indices = @transform_5, window_bounds = array<i64: 1, 128>}, {transform_indices = @transform_6, window_bounds = array<i64: 128, 128>}]} {
    %c0_i32 = arith.constant 0 : i32
    %0 = arith.cmpi eq, %arg1, %c0_i32 : i32
    %1 = arith.extui %0 : i1 to i32
    %c0_i32_0 = arith.constant 0 : i32
    %2 = arith.cmpi ne, %1, %c0_i32_0 : i32
    scf.if %2 {
      %cst_13 = arith.constant 0.000000e+00 : f32
      %15 = vector.broadcast %cst_13 : f32 to vector<128x128xf32>
      %c0_14 = arith.constant 0 : index
      %c0_15 = arith.constant 0 : index
      %16 = vector.load %arg9[%c0_14, %c0_15] : memref<128x128xf32, #tpu.memory_space<vmem>>, vector<128x128xf32>
      tpu.vector_store %arg9[%c0_14, %c0_15], %15 {strides = array<i32>} : memref<128x128xf32, #tpu.memory_space<vmem>>, vector<128x128xf32>,
    } else {
    }
    %c0 = arith.constant 0 : index
    %c0_1 = arith.constant 0 : index
    %3 = vector.load %arg3[%c0, %c0_1] : memref<128x128xbf16, #tpu.memory_space<vmem>>, vector<128x128xbf16>
    %c0_2 = arith.constant 0 : index
    %c0_3 = arith.constant 0 : index
    %4 = vector.load %arg5[%c0_2, %c0_3] : memref<128x128xbf16, #tpu.memory_space<vmem>>, vector<128x128xbf16>
    %cst = arith.constant dense<0.000000e+00> : vector<128x128xf32>
    %5 = tpu.matmul %3, %4, %cst {dimension_numbers = #tpu.dot_dimension_numbers<[1], [0], [0], [1], [0, 0, 1, 1], [], []>} : vector<128x128xbf16>, vector<128x128xbf16>, vector<128x128xf32> -> vector<128x128xf32>
    %6 = arith.truncf %5 : vector<128x128xf32> to vector<128x128xbf16>
    %c0_4 = arith.constant 0 : index
    %c0_5 = arith.constant 0 : index
    %7 = vector.load %arg9[%c0_4, %c0_5] : memref<128x128xf32, #tpu.memory_space<vmem>>, vector<128x128xf32>
    %c0_6 = arith.constant 0 : index
    %c0_7 = arith.constant 0 : index
    %8 = vector.load %arg2[%c0_6, %c0_7] : memref<128x128xbf16, #tpu.memory_space<vmem>>, vector<128x128xbf16>
    %cst_8 = arith.constant dense<0.000000e+00> : vector<128x128xf32>
    %9 = tpu.matmul %8, %6, %cst_8 {dimension_numbers = #tpu.dot_dimension_numbers<[1], [0], [0], [1], [0, 0, 1, 1], [], []>} : vector<128x128xbf16>, vector<128x128xbf16>, vector<128x128xf32> -> vector<128x128xf32>
    %10 = arith.addf %7, %9 : vector<128x128xf32>
    %c0_9 = arith.constant 0 : index
    %c0_10 = arith.constant 0 : index
    %11 = vector.load %arg9[%c0_9, %c0_10] : memref<128x128xf32, #tpu.memory_space<vmem>>, vector<128x128xf32>
    tpu.vector_store %arg9[%c0_9, %c0_10], %10 {strides = array<i32>} : memref<128x128xf32, #tpu.memory_space<vmem>>, vector<128x128xf32>,
    %c0_i32_11 = arith.constant 0 : i32
    %12 = arith.cmpi eq, %arg1, %c0_i32_11 : i32
    %13 = arith.extui %12 : i1 to i32
    %c0_i32_12 = arith.constant 0 : i32
    %14 = arith.cmpi ne, %13, %c0_i32_12 : i32
    scf.if %14 {
      %c0_13 = arith.constant 0 : index
      %c0_14 = arith.constant 0 : index
      %15 = vector.load %arg4[%c0_13, %c0_14] : memref<128x128xbf16, #tpu.memory_space<vmem>>, vector<128x128xbf16>
      %c0_15 = arith.constant 0 : index
      %c0_16 = arith.constant 0 : index
      %16 = vector.load %arg6[%c0_15, %c0_16] : memref<128x128xbf16, #tpu.memory_space<vmem>>, vector<128x128xbf16>
      %cst_17 = arith.constant dense<0.000000e+00> : vector<128x128xf32>
      %17 = tpu.matmul %15, %16, %cst_17 {dimension_numbers = #tpu.dot_dimension_numbers<[1], [0], [0], [1], [0, 0, 1, 1], [], []>} : vector<128x128xbf16>, vector<128x128xbf16>, vector<128x128xf32> -> vector<128x128xf32>
      %c0_18 = arith.constant 0 : index
      %c0_19 = arith.constant 0 : index
      %18 = vector.load %arg7[%c0_18, %c0_19] : memref<1x128xf32, #tpu.memory_space<vmem>>, vector<1x128xf32>
      %19 = vector.broadcast %18 : vector<1x128xf32> to vector<128x128xf32>
      %20 = arith.addf %17, %19 : vector<128x128xf32>
      %c0_20 = arith.constant 0 : index
      %c0_21 = arith.constant 0 : index
      %21 = vector.load %arg9[%c0_20, %c0_21] : memref<128x128xf32, #tpu.memory_space<vmem>>, vector<128x128xf32>
      %22 = arith.addf %21, %20 : vector<128x128xf32>
      %cst_22 = arith.constant 0.000000e+00 : f32
      %23 = vector.broadcast %cst_22 : f32 to vector<128x128xf32>
      %24 = arith.cmpf oge, %22, %23 : vector<128x128xf32>
      %cst_23 = arith.constant 1.000000e-01 : f32
      %25 = vector.broadcast %cst_23 : f32 to vector<128x128xf32>
      %26 = arith.mulf %25, %22 : vector<128x128xf32>
      %27 = arith.select %24, %22, %26 : vector<128x128xi1>, vector<128x128xf32>
      %28 = arith.truncf %27 : vector<128x128xf32> to vector<128x128xbf16>
      %c0_24 = arith.constant 0 : index
      %c0_25 = arith.constant 0 : index
      %29 = vector.load %arg8[%c0_24, %c0_25] : memref<128x128xbf16, #tpu.memory_space<vmem>>, vector<128x128xbf16>
      tpu.vector_store %arg8[%c0_24, %c0_25], %28 {strides = array<i32>} : memref<128x128xbf16, #tpu.memory_space<vmem>>, vector<128x128xbf16>,
    } else {
    }
    return
  }
  func.func @transform_0(%arg0: i32, %arg1: i32) -> (i32, i32) {
    %c0_i32 = arith.constant 0 : i32
    return %arg0, %arg1 : i32, i32
  }
  func.func @transform_1(%arg0: i32, %arg1: i32) -> (i32, i32) {
    %c0_i32 = arith.constant 0 : i32
    %c0_i32_0 = arith.constant 0 : i32
    return %arg1, %c0_i32 : i32, i32
  }
  func.func @transform_2(%arg0: i32, %arg1: i32) -> (i32, i32) {
    %c0_i32 = arith.constant 0 : i32
    %c0_i32_0 = arith.constant 0 : i32
    return %arg0, %c0_i32 : i32, i32
  }
  func.func @transform_3(%arg0: i32, %arg1: i32) -> (i32, i32) {
    %c0_i32 = arith.constant 0 : i32
    %c0_i32_0 = arith.constant 0 : i32
    %c0_i32_1 = arith.constant 0 : i32
    return %c0_i32, %c0_i32_0 : i32, i32
  }
  func.func @transform_4(%arg0: i32, %arg1: i32) -> (i32, i32) {
    %c0_i32 = arith.constant 0 : i32
    %c0_i32_0 = arith.constant 0 : i32
    %c0_i32_1 = arith.constant 0 : i32
    return %c0_i32, %c0_i32_0 : i32, i32
  }
  func.func @transform_5(%arg0: i32, %arg1: i32) -> (i32, i32) {
    %c0_i32 = arith.constant 0 : i32
    %c0_i32_0 = arith.constant 0 : i32
    %c0_i32_1 = arith.constant 0 : i32
    return %c0_i32, %c0_i32_0 : i32, i32
  }
  func.func @transform_6(%arg0: i32, %arg1: i32) -> (i32, i32) {
    %c0_i32 = arith.constant 0 : i32
    %c0_i32_0 = arith.constant 0 : i32
    return %arg0, %c0_i32 : i32, i32
  }
}

module attributes {stable_mosaic.version = 11 : i64} {
  func.func @_sage_kernel(%arg0: i32, %arg1: i32, %arg2: memref<128x128xbf16, #tpu.memory_space<vmem>>, %arg3: memref<128x128xbf16, #tpu.memory_space<vmem>>, %arg4: memref<128x128xbf16, #tpu.memory_space<vmem>>, %arg5: memref<128x128xbf16, #tpu.memory_space<vmem>>, %arg6: memref<128x128xbf16, #tpu.memory_space<vmem>>, %arg7: memref<1x128xf32, #tpu.memory_space<vmem>>, %arg8: memref<128x128xf32, #tpu.memory_space<vmem>>, %arg9: memref<128x128xf32, #tpu.memory_space<vmem>>) attributes {dimension_semantics = [#tpu.dimension_semantics<parallel>, #tpu.dimension_semantics<arbitrary>], iteration_bounds = array<i64: 1, 1>, scalar_prefetch = 0 : i64, scratch_operands = 1 : i64, tpu.core_type = #tpu.core_type<tc>, window_params = [{transform_indices = @transform_0, window_bounds = array<i64: 128, 128>}, {transform_indices = @transform_1, window_bounds = array<i64: 128, 128>}, {transform_indices = @transform_2, window_bounds = array<i64: 128, 128>}, {pipeline_mode = #tpu.pipeline_mode<synchronous>, transform_indices = @transform_3, window_bounds = array<i64: 128, 128>}, {pipeline_mode = #tpu.pipeline_mode<synchronous>, transform_indices = @transform_4, window_bounds = array<i64: 128, 128>}, {pipeline_mode = #tpu.pipeline_mode<synchronous>, transform_indices = @transform_5, window_bounds = array<i64: 1, 128>}, {transform_indices = @transform_6, window_bounds = array<i64: 128, 128>}]} {
    %c0_i32 = arith.constant 0 : i32
    %0 = arith.cmpi eq, %arg1, %c0_i32 : i32
    %1 = arith.extui %0 : i1 to i32
    %c0_i32_0 = arith.constant 0 : i32
    %2 = arith.cmpi ne, %1, %c0_i32_0 : i32
    scf.if %2 {
      %cst_13 = arith.constant 0.000000e+00 : f32
      %15 = vector.broadcast %cst_13 : f32 to vector<128x128xf32>
      %c0_14 = arith.constant 0 : index
      %c0_15 = arith.constant 0 : index
      %16 = vector.load %arg9[%c0_14, %c0_15] : memref<128x128xf32, #tpu.memory_space<vmem>>, vector<128x128xf32>
      tpu.vector_store %arg9[%c0_14, %c0_15], %15 {strides = array<i32>} : memref<128x128xf32, #tpu.memory_space<vmem>>, vector<128x128xf32>,
    } else {
    }
    %c0 = arith.constant 0 : index
    %c0_1 = arith.constant 0 : index
    %3 = vector.load %arg3[%c0, %c0_1] : memref<128x128xbf16, #tpu.memory_space<vmem>>, vector<128x128xbf16>
    %c0_2 = arith.constant 0 : index
    %c0_3 = arith.constant 0 : index
    %4 = vector.load %arg5[%c0_2, %c0_3] : memref<128x128xbf16, #tpu.memory_space<vmem>>, vector<128x128xbf16>
    %cst = arith.constant dense<0.000000e+00> : vector<128x128xf32>
    %5 = tpu.matmul %3, %4, %cst {dimension_numbers = #tpu.dot_dimension_numbers<[1], [0], [0], [1], [0, 0, 1, 1], [], []>} : vector<128x128xbf16>, vector<128x128xbf16>, vector<128x128xf32> -> vector<128x128xf32>
    %6 = arith.truncf %5 : vector<128x128xf32> to vector<128x128xbf16>
    %c0_4 = arith.constant 0 : index
    %c0_5 = arith.constant 0 : index
    %7 = vector.load %arg9[%c0_4, %c0_5] : memref<128x128xf32, #tpu.memory_space<vmem>>, vector<128x128xf32>
    %c0_6 = arith.constant 0 : index
    %c0_7 = arith.constant 0 : index
    %8 = vector.load %arg2[%c0_6, %c0_7] : memref<128x128xbf16, #tpu.memory_space<vmem>>, vector<128x128xbf16>
    %cst_8 = arith.constant dense<0.000000e+00> : vector<128x128xf32>
    %9 = tpu.matmul %8, %6, %cst_8 {dimension_numbers = #tpu.dot_dimension_numbers<[1], [0], [0], [1], [0, 0, 1, 1], [], []>} : vector<128x128xbf16>, vector<128x128xbf16>, vector<128x128xf32> -> vector<128x128xf32>
    %10 = arith.addf %7, %9 : vector<128x128xf32>
    %c0_9 = arith.constant 0 : index
    %c0_10 = arith.constant 0 : index
    %11 = vector.load %arg9[%c0_9, %c0_10] : memref<128x128xf32, #tpu.memory_space<vmem>>, vector<128x128xf32>
    tpu.vector_store %arg9[%c0_9, %c0_10], %10 {strides = array<i32>} : memref<128x128xf32, #tpu.memory_space<vmem>>, vector<128x128xf32>,
    %c0_i32_11 = arith.constant 0 : i32
    %12 = arith.cmpi eq, %arg1, %c0_i32_11 : i32
    %13 = arith.extui %12 : i1 to i32
    %c0_i32_12 = arith.constant 0 : i32
    %14 = arith.cmpi ne, %13, %c0_i32_12 : i32
    scf.if %14 {
      %c0_13 = arith.constant 0 : index
      %c0_14 = arith.constant 0 : index
      %15 = vector.load %arg4[%c0_13, %c0_14] : memref<128x128xbf16, #tpu.memory_space<vmem>>, vector<128x128xbf16>
      %c0_15 = arith.constant 0 : index
      %c0_16 = arith.constant 0 : index
      %16 = vector.load %arg6[%c0_15, %c0_16] : memref<128x128xbf16, #tpu.memory_space<vmem>>, vector<128x128xbf16>
      %cst_17 = arith.constant dense<0.000000e+00> : vector<128x128xf32>
      %17 = tpu.matmul %15, %16, %cst_17 {dimension_numbers = #tpu.dot_dimension_numbers<[1], [0], [0], [1], [0, 0, 1, 1], [], []>} : vector<128x128xbf16>, vector<128x128xbf16>, vector<128x128xf32> -> vector<128x128xf32>
      %c0_18 = arith.constant 0 : index
      %c0_19 = arith.constant 0 : index
      %18 = vector.load %arg7[%c0_18, %c0_19] : memref<1x128xf32, #tpu.memory_space<vmem>>, vector<1x128xf32>
      %19 = vector.broadcast %18 : vector<1x128xf32> to vector<128x128xf32>
      %20 = arith.addf %17, %19 : vector<128x128xf32>
      %c0_20 = arith.constant 0 : index
      %c0_21 = arith.constant 0 : index
      %21 = vector.load %arg9[%c0_20, %c0_21] : memref<128x128xf32, #tpu.memory_space<vmem>>, vector<128x128xf32>
      %22 = arith.addf %21, %20 : vector<128x128xf32>
      %cst_22 = arith.constant 0.000000e+00 : f32
      %23 = vector.broadcast %cst_22 : f32 to vector<128x128xf32>
      %24 = arith.subf %23, %22 : vector<128x128xf32>
      %25 = math.exp %24 : vector<128x128xf32>
      %cst_23 = arith.constant 1.000000e+00 : f32
      %26 = vector.broadcast %cst_23 : f32 to vector<128x128xf32>
      %27 = arith.addf %26, %25 : vector<128x128xf32>
      %28 = tpu.reciprocal %27 {approx = true} : vector<128x128xf32> -> vector<128x128xf32>
      %cst_24 = arith.constant 1.000000e+00 : f32
      %29 = vector.broadcast %cst_24 : f32 to vector<128x128xf32>
      %30 = arith.minimumf %28, %29 : vector<128x128xf32>
      %c0_25 = arith.constant 0 : index
      %c0_26 = arith.constant 0 : index
      %31 = vector.load %arg8[%c0_25, %c0_26] : memref<128x128xf32, #tpu.memory_space<vmem>>, vector<128x128xf32>
      tpu.vector_store %arg8[%c0_25, %c0_26], %30 {strides = array<i32>} : memref<128x128xf32, #tpu.memory_space<vmem>>, vector<128x128xf32>,
    } else {
    }
    return
  }
  func.func @transform_0(%arg0: i32, %arg1: i32) -> (i32, i32) {
    %c0_i32 = arith.constant 0 : i32
    return %arg0, %arg1 : i32, i32
  }
  func.func @transform_1(%arg0: i32, %arg1: i32) -> (i32, i32) {
    %c0_i32 = arith.constant 0 : i32
    %c0_i32_0 = arith.constant 0 : i32
    return %arg1, %c0_i32 : i32, i32
  }
  func.func @transform_2(%arg0: i32, %arg1: i32) -> (i32, i32) {
    %c0_i32 = arith.constant 0 : i32
    %c0_i32_0 = arith.constant 0 : i32
    return %arg0, %c0_i32 : i32, i32
  }
  func.func @transform_3(%arg0: i32, %arg1: i32) -> (i32, i32) {
    %c0_i32 = arith.constant 0 : i32
    %c0_i32_0 = arith.constant 0 : i32
    %c0_i32_1 = arith.constant 0 : i32
    return %c0_i32, %c0_i32_0 : i32, i32
  }
  func.func @transform_4(%arg0: i32, %arg1: i32) -> (i32, i32) {
    %c0_i32 = arith.constant 0 : i32
    %c0_i32_0 = arith.constant 0 : i32
    %c0_i32_1 = arith.constant 0 : i32
    return %c0_i32, %c0_i32_0 : i32, i32
  }
  func.func @transform_5(%arg0: i32, %arg1: i32) -> (i32, i32) {
    %c0_i32 = arith.constant 0 : i32
    %c0_i32_0 = arith.constant 0 : i32
    %c0_i32_1 = arith.constant 0 : i32
    return %c0_i32, %c0_i32_0 : i32, i32
  }
  func.func @transform_6(%arg0: i32, %arg1: i32) -> (i32, i32) {
    %c0_i32 = arith.constant 0 : i32
    %c0_i32_0 = arith.constant 0 : i32
    return %arg0, %c0_i32 : i32, i32
  }
}

</mosaic_0001>

<bundles_post_ra>
// kernel: gcn_forward.8
= control target key start
LH: loop header
LB: loop body
LE: loop exit
PB: predicated region body
PF: predicated region fallthrough
CT: control target
= control target key end

     0   :  { %10 = vsyncpa [#allocation3], 0  ;;  %s173_s21 = smov [#allocation2]   ;;  %s237_s0 = inlined_call_operand.vmem [shape: f32[12,5], index: 0, kind: input, shape index: {}]   ;;  %s238_s1 = inlined_call_operand.hbm [shape: f32[5,32], index: 1, kind: input, shape index: {}]   ;;  %s239_s2 = inlined_call_operand.vmem [shape: f32[1,32], index: 2, kind: input, shape index: {}]   ;;  %s240_s3 = inlined_call_operand.vmem [shape: f32[32,128], index: 3, kind: input, shape index: {}]   ;;  %s241_s4 = inlined_call_operand.vmem [shape: f32[1,128], index: 4, kind: input, shape index: {}]   ;;  %s242_s5 = inlined_call_operand.vmem [shape: bf16[12,128], index: 5, kind: output, shape index: {}]  }
   0x1   :  { %s18_s20 = sshll.u32 %s238_s1, 4  ;;  %s20_s22 = sshll.u32 %s173_s21, 4  ;;  %s19_s20 = int_to_ptr.hbm [resolvable:$true] %s18_s20  ;;  %s21_s22 = int_to_ptr.vmem [resolvable:$true] %s20_s22 }
   0x2   :  { %23 = dma.hbm_to_vmem [thread:$0]  %s19_s20, 128, %s21_s22, [#allocation3]  }
   0x3   :  { %171 = dma.done.wait [#allocation3], 128  }
   0x4   :  { %172 = vsyncadd [#allocation3], 4294967168  ;;  %vm48_vm0 = vcmask 1044480   ;;  %vm41_vm1 = vcmask 39936   ;;  %v36_v0 = vld [vmem:[#allocation2] sm:$0x1f] }
   0x5   :  { %v35_v1 = vld [vmem:[%s237_s0 + $0x8] sm:$0xf]  ;;  %v34_v2 = vld [vmem:[%s237_s0] sm:$0xff]  ;;  %139 = vmatpush.msk.msra.mxu3 %vm48_vm0, %v36_v0  ;;  %134 = vmatpush.msk.msra.mxu0 %vm48_vm0, %v36_v0  ;;  %v84_v3 = vld [vmem:[%s240_s3 + $0x18] sm:$0xff]  ;;  %vm89_vm3 = vcmask 261120  }
   0x6   :  { %136 = vmatmul.msk.f32.vlgmr.msra.gmra.mxu3 %vm41_vm1, %v35_v1  ;;  %135 = vmatmul.msk.f32.vlgmr.msra.gmra.mxu0 %vm41_vm1, %v34_v2  ;;  %v83_v4 = vld [vmem:[%s240_s3 + $0x10] sm:$0xff]  ;;  %v82_v5 = vld [vmem:[%s240_s3 + $0x8] sm:$0xff]  ;;  %v81_v6 = vld [vmem:[%s240_s3] sm:$0xff] }
   0x7   :  { %140 = vmatpush.msra.mxu2 %v84_v3  ;;  %108 = vmatpush.msra.mxu1 %v84_v3  ;;  %v145_v7 = vld [vmem:[%s239_s2] ss:$0 sm:$0xff] }
   0x8   :  { %v146_v16 = vld [vmem:[%s241_s4] ss:$0 sm:$0xff] }
   0x9   :  { %141 = vmatpush.msra.mxu2 %v83_v4  ;;  %109 = vmatpush.msra.mxu1 %v83_v4 }
   0xb   :  { %142 = vmatpush.msra.mxu2 %v82_v5  ;;  %110 = vmatpush.msra.mxu1 %v82_v5 }
   0xd   :  { %143 = vmatpush.msra.mxu2 %v81_v6  ;;  %111 = vmatpush.msra.mxu1 %v81_v6 }
  0x83   :  { %v69_v8 = vpop.f32.mrf.mxu0 }
  0x84   :  { %v70_v9 = vadd.f32 %v145_v7, %v69_v8 }
  0x86   :  { %v77_v10 = vmul.f32 0.1, %v70_v9  ;;  %vm75_vm2 = vcmp.ge.f32.partialorder %v70_v9, 0.0 }
  0x88   :  { %v79_v11 = vsel %vm75_vm2, %v70_v9, %v77_v10 }
  0x89   :  { %v72_v12 = vpop.f32.mrf.mxu3  ;;  %137 = vmatmul.msk.f32.vlgmr.msra.gmra.mxu1 %vm89_vm3, %v79_v11 }
  0x8a   :  { %v73_v13 = vadd.f32 %v145_v7, %v72_v12 }
  0x8c   :  { %v78_v14 = vmul.f32 0.1, %v73_v13  ;;  %vm76_vm4 = vcmp.ge.f32.partialorder %v73_v13, 0.0 }
  0x8e   :  { %v80_v15 = vsel %vm76_vm4, %v73_v13, %v78_v14 }
  0x8f   :  { %138 = vmatmul.msk.f32.vlgmr.msra.gmra.mxu2 %vm89_vm3, %v80_v15 }
 0x106   :  { %v113_v17 = vpop.f32.mrf.mxu1 }
 0x107   :  { %v114_v18 = vadd.f32 %v146_v16, %v113_v17 }
 0x109   :  { %vm119_vm5 = vcmp.ge.f32.partialorder %v114_v18, 0.0  ;;  %v121_v19 = vmul.f32 0.1, %v114_v18 }
 0x10b   :  { %v123_v20 = vsel %vm119_vm5, %v114_v18, %v121_v19 }
 0x10c   :  { %v125_v21 = vpack.c.bf16 %v123_v20, %v123_v20 }
 0x10e   :  { %127 = vst [vmem:[%s242_s5] sm:$0xf] %v125_v21 }
 0x112   :  { %v116_v22 = vpop.f32.mrf.mxu2 }
 0x113   :  { %v117_v23 = vadd.f32 %v146_v16, %v116_v22 }
 0x115   :  { %vm120_vm6 = vcmp.ge.f32.partialorder %v117_v23, 0.0  ;;  %v122_v24 = vmul.f32 0.1, %v117_v23 }
 0x117   :  { %v124_v25 = vsel %vm120_vm6, %v117_v23, %v122_v24 }
 0x118   :  { %v126_v26 = vpack.c.bf16 %v124_v25, %v124_v25 }
 0x11a   :  { %128 = vst [vmem:[%s242_s5 + $0x4] sm:$0x3] %v126_v26 }
 0x11b   :  { %133 = vsyncpa [#allocation3], 1 }

// kernel: gcn_forward.6
= control target key start
LH: loop header
LB: loop body
LE: loop exit
PB: predicated region body
PF: predicated region fallthrough
CT: control target
= control target key end

     0   :  { %10 = vsyncpa [#allocation3], 0  ;;  %s325_s0 = inlined_call_operand.hbm [shape: f32[4,3], index: 0, kind: input, shape index: {}]   ;;  %s326_s1 = inlined_call_operand.hbm [shape: f32[3,32], index: 1, kind: input, shape index: {}]   ;;  %s327_s2 = inlined_call_operand.vmem [shape: f32[1,32], index: 2, kind: input, shape index: {}]   ;;  %s328_s3 = inlined_call_operand.hbm [shape: f32[32,128], index: 3, kind: input, shape index: {}]   ;;  %s329_s4 = inlined_call_operand.hbm [shape: f32[1,128], index: 4, kind: input, shape index: {}]   ;;  %s330_s5 = inlined_call_operand.vmem [shape: bf16[4,128], index: 5, kind: output, shape index: {}]  }
   0x1   :  { %11 = vsyncpa [#allocation5], 0  ;;  %s29_s20 = sshll.u32 %s326_s1, 4  ;;  %s30_s20 = int_to_ptr.hbm [resolvable:$true] %s29_s20 }
   0x2   :  { %12 = vsyncpa [#allocation8], 0  ;;  %s271_s21 = smov [#allocation4]   ;;  %s18_s25 = sshll.u32 %s325_s0, 4  ;;  %s19_s25 = int_to_ptr.hbm [resolvable:$true] %s18_s25 }
   0x3   :  { %s31_s22 = sshll.u32 %s271_s21, 4  ;;  %s272_s26 = smov [#allocation2]   ;;  %s32_s22 = int_to_ptr.vmem [resolvable:$true] %s31_s22 }
   0x4   :  { %34 = dma.hbm_to_vmem [thread:$0]  %s30_s20, 64, %s32_s22, [#allocation5]  }
   0x5   :  { %s20_s27 = sshll.u32 %s272_s26, 4  ;;  %s41_s30 = sshll.u32 %s328_s3, 4  ;;  %s21_s27 = int_to_ptr.vmem [resolvable:$true] %s20_s27  ;;  %s42_s30 = int_to_ptr.hbm [resolvable:$true] %s41_s30 }
   0x6   :  { %23 = dma.hbm_to_vmem [thread:$0]  %s19_s25, 64, %s21_s27, [#allocation3]  }
   0x7   :  { %s273_s1 = smov [#allocation6]   ;;  %s55_s9 = sshll.u32 %s329_s4, 4  ;;  %s56_s9 = int_to_ptr.hbm [resolvable:$true] %s55_s9 }
   0x8   :  { %s43_s6 = sshll.u32 %s273_s1, 4  ;;  %s274_s10 = smov 128   ;;  %s44_s6 = int_to_ptr.vmem [resolvable:$true] %s43_s6 }
   0x9   :  { %s275_s0 = smov 8   ;;  %s276_s11 = smov [#allocation7]  }
   0xa   :  { %49 = dma.hbm_to_vmem [thread:$0]  %s42_s30, 512, %s44_s6, [#allocation5], %s274_s10, %s274_s10, %s275_s0  }
   0xb   :  { %s57_s12 = sshll.u32 %s276_s11, 4  ;;  %s58_s12 = int_to_ptr.vmem [resolvable:$true] %s57_s12 }
   0xc   :  { %60 = dma.hbm_to_vmem [thread:$0]  %s56_s9, 16, %s58_s12, [#allocation8]  }
   0xd   :  { %265 = dma.done.wait [#allocation3], 64  }
   0xe   :  { %266 = vsyncadd [#allocation3], 4294967232 }
   0xf   :  { %267 = dma.done.wait [#allocation5], 576  }
  0x10   :  { %268 = vsyncadd [#allocation5], 4294966720 }
  0x11   :  { %269 = dma.done.wait [#allocation8], 16  }
  0x12   :  { %270 = vsyncadd [#allocation8], 4294967280  ;;  %vm87_vm0 = vcmask 1042432   ;;  %vm83_vm1 = vcmask 23552   ;;  %v78_v0 = vld [vmem:[#allocation4] sm:$0x7] }
  0x13   :  { %v77_v1 = vld [vmem:[#allocation2] sm:$0xf]  ;;  %158 = vmatpush.msk.msra.mxu0 %vm87_vm0, %v78_v0  ;;  %v116_v3 = vld [vmem:[#allocation6 + $0x10] sm:$0xff]  ;;  %v115_v4 = vld [vmem:[#allocation6 + $0x8] sm:$0xff]  ;;  %vm122_vm3 = vcmask 261120  }
  0x14   :  { %v117_v2 = vld [vmem:[#allocation6 + $0x18] sm:$0xff]  ;;  %159 = vmatmul.msk.f32.vlgmr.msra.gmra.mxu0 %vm83_vm1, %v77_v1  ;;  %v114_v5 = vld [vmem:[#allocation6] sm:$0xff] }
  0x15   :  { %138 = vmatpush.msra.mxu1 %v117_v2  ;;  %v167_v6 = vld [vmem:[%s327_s2] ss:$0 sm:$0xff]  ;;  %v168_v11 = vld [vmem:[#allocation7] ss:$0 sm:$0xff] }
  0x17   :  { %139 = vmatpush.msra.mxu1 %v116_v3 }
  0x19   :  { %140 = vmatpush.msra.mxu1 %v115_v4 }
  0x1b   :  { %141 = vmatpush.msra.mxu1 %v114_v5 }
  0x91   :  { %v108_v7 = vpop.f32.mrf.mxu0 }
  0x92   :  { %v109_v8 = vadd.f32 %v167_v6, %v108_v7 }
  0x94   :  { %v112_v9 = vmul.f32 0.1, %v109_v8  ;;  %vm111_vm2 = vcmp.ge.f32.partialorder %v109_v8, 0.0 }
  0x96   :  { %v113_v10 = vsel %vm111_vm2, %v109_v8, %v112_v9 }
  0x97   :  { %160 = vmatmul.msk.f32.vlgmr.msra.gmra.mxu1 %vm122_vm3, %v113_v10 }
 0x114   :  { %v143_v12 = vpop.f32.mrf.mxu1 }
 0x115   :  { %v144_v13 = vadd.f32 %v168_v11, %v143_v12 }
 0x117   :  { %vm146_vm4 = vcmp.ge.f32.partialorder %v144_v13, 0.0  ;;  %v147_v14 = vmul.f32 0.1, %v144_v13 }
 0x119   :  { %v148_v15 = vsel %vm146_vm4, %v144_v13, %v147_v14 }
 0x11a   :  { %v149_v16 = vpack.c.bf16 %v148_v15, %v148_v15 }
 0x11c   :  { %150 = vst [vmem:[%s330_s5] sm:$0x3] %v149_v16 }
 0x11d   :  { %155 = vsyncpa [#allocation3], 1 }
 0x11e   :  { %156 = vsyncpa [#allocation5], 1 }
 0x11f   :  { %157 = vsyncpa [#allocation8], 1 }

// kernel: gcn_forward.9
= control target key start
LH: loop header
LB: loop body
LE: loop exit
PB: predicated region body
PF: predicated region fallthrough
CT: control target
= control target key end

     0   :  { %11 = vsyncpa [#allocation4], 0  ;;  %s1213_s0 = inlined_call_operand.hbm [shape: bf16[128,128], index: 0, kind: input, shape index: {}]   ;;  %s1214_s1 = inlined_call_operand.vmem [shape: bf16[128,128], index: 1, kind: input, shape index: {}, may-alias: {1,2}]   ;;  %s1215_s2 = inlined_call_operand.vmem [shape: bf16[128,128], index: 2, kind: input, shape index: {}, may-alias: {1,2}]   ;;  %s1216_s3 = inlined_call_operand.vmem [shape: bf16[128,128], index: 3, kind: input, shape index: {}]   ;;  %s1217_s4 = inlined_call_operand.hbm [shape: bf16[128,128], index: 4, kind: input, shape index: {}]   ;;  %s1218_s5 = inlined_call_operand.vmem [shape: f32[1,128], index: 5, kind: input, shape index: {}]   ;;  %s1219_s6 = inlined_call_operand.vmem [shape: bf16[128,128], index: 6, kind: output, shape index: {}]  }
   0x1   :  { %s17_s23 = sshll.u32 %s1213_s0, 4  ;;  %s18_s23 = int_to_ptr.hbm [resolvable:$true] %s17_s23 }
   0x2   :  { %12 = vsyncpa [#allocation6], 0  ;;  %s1051_s24 = smov [#allocation3]   ;;  %s36_s28 = sshll.u32 %s1217_s4, 4  ;;  %s37_s28 = int_to_ptr.hbm [resolvable:$true] %s36_s28 }
   0x3   :  { %s19_s25 = sshll.u32 %s1051_s24, 4  ;;  %s1052_s29 = smov 64   ;;  %s20_s25 = int_to_ptr.vmem [resolvable:$true] %s19_s25 }
   0x4   :  { %s1053_s30 = smov 4   ;;  %s1054_s7 = smov [#allocation5]  }
   0x5   :  { %25 = dma.hbm_to_vmem [thread:$0]  %s18_s23, 1024, %s20_s25, [#allocation4], %s1052_s29, %s1052_s29, %s1053_s30  }
   0x6   :  { %s38_s8 = sshll.u32 %s1054_s7, 4  ;;  %s39_s8 = int_to_ptr.vmem [resolvable:$true] %s38_s8 }
   0x7   :  { %44 = dma.hbm_to_vmem [thread:$0]  %s37_s28, 1024, %s39_s8, [#allocation6], %s1052_s29, %s1052_s29, %s1053_s30  }
   0x8   :  { %1047 = dma.done.wait [#allocation4], 1024  }
   0x9   :  { %1048 = vsyncadd [#allocation4], 4294966272 }
   0xa   :  { %1049 = dma.done.wait [#allocation6], 1024  }
   0xb   :  { %1050 = vsyncadd [#allocation6], 4294966272  ;;  %v898_v0 = vld [vmem:[%s1216_s3 + $0x38] sm:$0xff]  ;;  %v897_v1 = vld [vmem:[%s1216_s3 + $0x30] sm:$0xff] }
   0xc   :  { %203 = vmatpush.bf16.msra.mxu0 %v898_v0  ;;  %970 = vmatpush.bf16.msra.mxu3 %v898_v0  ;;  %v896_v2 = vld [vmem:[%s1216_s3 + $0x28] sm:$0xff]  ;;  %v895_v3 = vld [vmem:[%s1216_s3 + $0x20] sm:$0xff]  ;;  %v894_v4 = vld [vmem:[%s1216_s3 + $0x18] sm:$0xff] }
   0xd   :  { %v893_v5 = vld [vmem:[%s1216_s3 + $0x10] sm:$0xff]  ;;  %v892_v6 = vld [vmem:[%s1216_s3 + $0x8] sm:$0xff]  ;;  %v891_v7 = vld [vmem:[%s1216_s3] sm:$0xff] }
   0xe   :  { %v883_v8 = vld [vmem:[%s1214_s1] sm:$0xff]  ;;  %v889_v9 = vld [vmem:[%s1214_s1 + $0x30] sm:$0xff]  ;;  %v884_v10 = vld [vmem:[%s1214_s1 + $0x8] sm:$0xff] }
   0xf   :  { %v890_v11 = vld [vmem:[%s1214_s1 + $0x38] sm:$0xff]  ;;  %v885_v12 = vld [vmem:[%s1214_s1 + $0x10] sm:$0xff]  ;;  %v887_v14 = vld [vmem:[%s1214_s1 + $0x20] sm:$0xff] }
  0x10   :  { %204 = vmatpush.bf16.msra.mxu0 %v897_v1  ;;  %971 = vmatpush.bf16.msra.mxu3 %v897_v1  ;;  %v886_v13 = vld [vmem:[%s1214_s1 + $0x18] sm:$0xff]  ;;  %v888_v15 = vld [vmem:[%s1214_s1 + $0x28] sm:$0xff]  ;;  %v921_v30 = vld [vmem:[#allocation5 + $0x30] sm:$0xff] }
  0x11   :  { %v922_v28 = vld [vmem:[#allocation5 + $0x38] sm:$0xff]  ;;  %v920_v32 = vld [vmem:[#allocation5 + $0x28] sm:$0xff]  ;;  %v919_v33 = vld [vmem:[#allocation5 + $0x20] sm:$0xff] }
  0x12   :  { %556 = vmatpush.bf16.msra.mxu2 %v922_v28  ;;  %v918_v35 = vld [vmem:[#allocation5 + $0x18] sm:$0xff]  ;;  %v917_v36 = vld [vmem:[#allocation5 + $0x10] sm:$0xff]  ;;  %v916_v38 = vld [vmem:[#allocation5 + $0x8] sm:$0xff] }
  0x13   :  { %v915_v39 = vld [vmem:[#allocation5] sm:$0xff]  ;;  %v908_v44 = vld [vmem:[%s1215_s2 + $0x8] sm:$0xff]  ;;  %v909_v48 = vld [vmem:[%s1215_s2 + $0x10] sm:$0xff] }
  0x14   :  { %205 = vmatpush.bf16.msra.mxu0 %v896_v2  ;;  %972 = vmatpush.bf16.msra.mxu3 %v896_v2  ;;  %v907_v40 = vld [vmem:[%s1215_s2] sm:$0xff]  ;;  %v905_v52 = vld [vmem:[#allocation3 + $0x30] sm:$0xff]  ;;  %v910_v53 = vld [vmem:[%s1215_s2 + $0x18] sm:$0xff] }
  0x15   :  { %v899_v51 = vld [vmem:[#allocation3] sm:$0xff]  ;;  %v900_v54 = vld [vmem:[#allocation3 + $0x8] sm:$0xff]  ;;  %v906_v55 = vld [vmem:[#allocation3 + $0x38] sm:$0xff] }
  0x16   :  { %557 = vmatpush.bf16.msra.mxu2 %v921_v30  ;;  %v911_v56 = vld [vmem:[%s1215_s2 + $0x20] sm:$0xff]  ;;  %v901_v57 = vld [vmem:[#allocation3 + $0x10] sm:$0xff]  ;;  %v912_v59 = vld [vmem:[%s1215_s2 + $0x28] sm:$0xff] }
  0x17   :  { %v913_v58 = vld [vmem:[%s1215_s2 + $0x30] sm:$0xff]  ;;  %v902_v60 = vld [vmem:[#allocation3 + $0x18] sm:$0xff]  ;;  %v903_v62 = vld [vmem:[#allocation3 + $0x20] sm:$0xff] }
  0x18   :  { %206 = vmatpush.bf16.msra.mxu0 %v895_v3  ;;  %973 = vmatpush.bf16.msra.mxu3 %v895_v3  ;;  %v914_v61 = vld [vmem:[%s1215_s2 + $0x38] sm:$0xff]  ;;  %v904_v63 = vld [vmem:[#allocation3 + $0x28] sm:$0xff]  ;;  %v1171_v3 = vld [vmem:[%s1218_s5] ss:$0 sm:$0xff] }
  0x1a   :  { %558 = vmatpush.bf16.msra.mxu2 %v920_v32 }
  0x1c   :  { %207 = vmatpush.bf16.msra.mxu0 %v894_v4  ;;  %974 = vmatpush.bf16.msra.mxu3 %v894_v4 }
  0x1e   :  { %559 = vmatpush.bf16.msra.mxu2 %v919_v33 }
  0x20   :  { %208 = vmatpush.bf16.msra.mxu0 %v893_v5  ;;  %975 = vmatpush.bf16.msra.mxu3 %v893_v5 }
  0x22   :  { %560 = vmatpush.bf16.msra.mxu2 %v918_v35 }
  0x24   :  { %209 = vmatpush.bf16.msra.mxu0 %v892_v6  ;;  %976 = vmatpush.bf16.msra.mxu3 %v892_v6 }
  0x26   :  { %561 = vmatpush.bf16.msra.mxu2 %v917_v36 }
  0x28   :  { %210 = vmatpush.bf16.msra.mxu0 %v891_v7  ;;  %977 = vmatpush.bf16.msra.mxu3 %v891_v7 }
  0x2a   :  { %562 = vmatpush.bf16.msra.mxu2 %v916_v38 }
  0x2b   :  { %211 = vmatmul.bf16.vlgmr.msra.gmra.mxu0 %v883_v8  ;;  %241 = vmatmul.bf16.vlgmr.msra.gmra.mxu3 %v889_v9 }
  0x2e   :  { %563 = vmatpush.bf16.msra.mxu2 %v915_v39 }
  0x31   :  { %564 = vmatmul.bf16.vlgmr.msra.gmra.mxu2 %v907_v40 }
  0x3b   :  { %216 = vmatmul.bf16.gmra.mxu0 %v884_v10  ;;  %246 = vmatmul.bf16.gmra.mxu3 %v890_v11 }
  0x41   :  { %569 = vmatmul.bf16.gmra.mxu2 %v908_v44 }
  0x4b   :  { %221 = vmatmul.bf16.gmra.mxu0 %v885_v12 }
  0x51   :  { %574 = vmatmul.bf16.gmra.mxu2 %v909_v48 }
  0x5b   :  { %226 = vmatmul.bf16.gmra.mxu0 %v886_v13 }
  0x61   :  { %579 = vmatmul.bf16.gmra.mxu2 %v910_v53 }
  0x6b   :  { %231 = vmatmul.bf16.gmra.mxu0 %v887_v14 }
  0x71   :  { %584 = vmatmul.bf16.gmra.mxu2 %v911_v56 }
  0x7b   :  { %236 = vmatmul.bf16.gmra.mxu0 %v888_v15 }
  0x81   :  { %589 = vmatmul.bf16.gmra.mxu2 %v912_v59 }
  0xa8   :  { %v212_v16 = vpop.f32.mrf.mxu0 }
  0xae   :  { %v242_v17 = vpop.f32.mrf.mxu3 }
  0xb0   :  { %v214_v18 = vpop.f32.mrf.mxu0 }
  0xb1   :  { %v252_v19 = vpack.c.bf16 %v214_v18, %v212_v16 }
  0xb4   :  { %v565_v0 = vpop.f32.mrf.mxu2 }
  0xb5   :  { %v566_v5 = vadd.f32 %v1171_v3, %v565_v0 }
  0xb6   :  { %v244_v20 = vpop.f32.mrf.mxu3 }
  0xb7   :  { %v258_v29 = vpack.c.bf16 %v244_v20, %v242_v17 }
  0xb8   :  { %v217_v21 = vpop.f32.mrf.mxu0 }
  0xbc   :  { %v567_v1 = vpop.f32.mrf.mxu2 }
  0xbd   :  { %v568_v9 = vadd.f32 %v1171_v3, %v567_v1 }
  0xbe   :  { %v247_v22 = vpop.f32.mrf.mxu3 }
  0xc0   :  { %v219_v23 = vpop.f32.mrf.mxu0 }
  0xc1   :  { %v253_v24 = vpack.c.bf16 %v219_v23, %v217_v21 }
  0xc4   :  { %v570_v2 = vpop.f32.mrf.mxu2 }
  0xc5   :  { %v571_v20 = vadd.f32 %v1171_v3, %v570_v2 }
  0xc6   :  { %v249_v25 = vpop.f32.mrf.mxu3 }
  0xc7   :  { %v259_v26 = vpack.c.bf16 %v249_v25, %v247_v22 }
  0xc8   :  { %v222_v27 = vpop.f32.mrf.mxu0 }
  0xc9   :  { %340 = vmatpush.bf16.msra.mxu1 %v259_v26  ;;  %978 = vmatpush.bf16.msrb.mxu3 %v259_v26 }
  0xcc   :  { %v572_v6 = vpop.f32.mrf.mxu2 }
  0xcd   :  { %341 = vmatpush.bf16.msra.mxu1 %v258_v29  ;;  %979 = vmatpush.bf16.msrb.mxu3 %v258_v29  ;;  %v573_v23 = vadd.f32 %v1171_v3, %v572_v6 }
  0xd0   :  { %v224_v31 = vpop.f32.mrf.mxu0 }
  0xd1   :  { %v254_v50 = vpack.c.bf16 %v224_v31, %v222_v27 }
  0xd4   :  { %v575_v18 = vpop.f32.mrf.mxu2 }
  0xd8   :  { %v227_v34 = vpop.f32.mrf.mxu0 }
  0xdc   :  { %v577_v25 = vpop.f32.mrf.mxu2 }
  0xe0   :  { %v229_v37 = vpop.f32.mrf.mxu0 }
  0xe1   :  { %v255_v49 = vpack.c.bf16 %v229_v37, %v227_v34  ;;  %v576_v34 = vadd.f32 %v1171_v3, %v575_v18 }
  0xe8   :  { %v232_v41 = vpop.f32.mrf.mxu0 }
  0xf0   :  { %v234_v42 = vpop.f32.mrf.mxu0 }
  0xf1   :  { %v256_v47 = vpack.c.bf16 %v234_v42, %v232_v41 }
  0xf8   :  { %v237_v43 = vpop.f32.mrf.mxu0 }
 0x100   :  { %v239_v45 = vpop.f32.mrf.mxu0 }
 0x101   :  { %v257_v46 = vpack.c.bf16 %v239_v45, %v237_v43 }
 0x103   :  { %342 = vmatpush.bf16.msra.mxu1 %v257_v46  ;;  %980 = vmatpush.bf16.msrb.mxu3 %v257_v46 }
 0x107   :  { %343 = vmatpush.bf16.msra.mxu1 %v256_v47  ;;  %981 = vmatpush.bf16.msrb.mxu3 %v256_v47 }
 0x10b   :  { %344 = vmatpush.bf16.msra.mxu1 %v255_v49  ;;  %982 = vmatpush.bf16.msrb.mxu3 %v255_v49 }
 0x10f   :  { %345 = vmatpush.bf16.msra.mxu1 %v254_v50  ;;  %983 = vmatpush.bf16.msrb.mxu3 %v254_v50 }
 0x113   :  { %346 = vmatpush.bf16.msra.mxu1 %v253_v24  ;;  %984 = vmatpush.bf16.msrb.mxu3 %v253_v24 }
 0x117   :  { %347 = vmatpush.bf16.msra.mxu1 %v252_v19  ;;  %985 = vmatpush.bf16.msrb.mxu3 %v252_v19 }
 0x11a   :  { %348 = vmatmul.bf16.vlgmr.msra.gmra.mxu1 %v899_v51  ;;  %378 = vmatmul.bf16.vlgmr.msrb.gmra.mxu3 %v905_v52 }
 0x11b   :  { %986 = vmatpush.bf16.msra.mxu3 %v922_v28 }
 0x11f   :  { %987 = vmatpush.bf16.msra.mxu3 %v921_v30 }
 0x123   :  { %988 = vmatpush.bf16.msra.mxu3 %v920_v32 }
 0x127   :  { %989 = vmatpush.bf16.msra.mxu3 %v919_v33 }
 0x12a   :  { %353 = vmatmul.bf16.gmra.mxu1 %v900_v54  ;;  %383 = vmatmul.bf16.gmra.mxu3 %v906_v55 }
 0x12b   :  { %990 = vmatpush.bf16.msra.mxu3 %v918_v35  ;;  %v580_v35 = vpop.f32.mrf.mxu2 }
 0x12c   :  { %v581_v52 = vadd.f32 %v1171_v3, %v580_v35 }
 0x12f   :  { %991 = vmatpush.bf16.msra.mxu3 %v917_v36 }
 0x133   :  { %992 = vmatpush.bf16.msra.mxu3 %v916_v38  ;;  %v578_v38 = vadd.f32 %v1171_v3, %v577_v25  ;;  %v582_v44 = vpop.f32.mrf.mxu2 }
 0x137   :  { %993 = vmatpush.bf16.msra.mxu3 %v915_v39 }
 0x13a   :  { %358 = vmatmul.bf16.gmra.mxu1 %v901_v57  ;;  %594 = vmatmul.bf16.vlgmr.msra.gmra.mxu3 %v913_v58 }
 0x14a   :  { %363 = vmatmul.bf16.gmra.mxu1 %v902_v60  ;;  %599 = vmatmul.bf16.gmra.mxu3 %v914_v61  ;;  %v585_v60 = vpop.f32.mrf.mxu2 }
 0x15a   :  { %368 = vmatmul.bf16.gmra.mxu1 %v903_v62  ;;  %v583_v62 = vadd.f32 %v1171_v3, %v582_v44 }
 0x16a   :  { %373 = vmatmul.bf16.gmra.mxu1 %v904_v63 }
 0x197   :  { %v349_v4 = vpop.f32.mrf.mxu1 }
 0x198   :  { %v621_v7 = vadd.f32 %v566_v5, %v349_v4 }
 0x19a   :  { %v653_v11 = vmul.f32 0.1, %v621_v7  ;;  %vm637_vm0 = vcmp.ge.f32.partialorder %v621_v7, 0.0 }
 0x19c   :  { %v669_v14 = vsel %vm637_vm0, %v621_v7, %v653_v11  ;;  %v587_v11 = vpop.f32.mrf.mxu2 }
 0x19d   :  { %v379_v8 = vpop.f32.mrf.mxu3 }
 0x19f   :  { %v351_v10 = vpop.f32.mrf.mxu1 }
 0x1a0   :  { %v622_v12 = vadd.f32 %v568_v9, %v351_v10 }
 0x1a2   :  { %vm638_vm1 = vcmp.ge.f32.partialorder %v622_v12, 0.0  ;;  %v654_v13 = vmul.f32 0.1, %v622_v12 }
 0x1a4   :  { %v670_v15 = vsel %vm638_vm1, %v622_v12, %v654_v13  ;;  %v586_v13 = vadd.f32 %v1171_v3, %v585_v60  ;;  %v590_v25 = vpop.f32.mrf.mxu2 }
 0x1a5   :  { %v926_v16 = vpack.c.bf16 %v670_v15, %v669_v14  ;;  %v381_v17 = vpop.f32.mrf.mxu3 }
 0x1a7   :  { %927 = vst [vmem:[%s1219_s6] sm:$0xff] %v926_v16   ;;  %v354_v19 = vpop.f32.mrf.mxu1 }
 0x1a8   :  { %v623_v21 = vadd.f32 %v571_v20, %v354_v19 }
 0x1aa   :  { %v655_v26 = vmul.f32 0.1, %v623_v21  ;;  %vm639_vm2 = vcmp.ge.f32.partialorder %v623_v21, 0.0 }
 0x1ac   :  { %v671_v29 = vsel %vm639_vm2, %v623_v21, %v655_v26  ;;  %v588_v21 = vadd.f32 %v1171_v3, %v587_v11 }
 0x1ad   :  { %v384_v22 = vpop.f32.mrf.mxu3 }
 0x1af   :  { %v356_v24 = vpop.f32.mrf.mxu1 }
 0x1b0   :  { %v624_v27 = vadd.f32 %v573_v23, %v356_v24 }
 0x1b2   :  { %vm640_vm3 = vcmp.ge.f32.partialorder %v624_v27, 0.0  ;;  %v656_v28 = vmul.f32 0.1, %v624_v27 }
 0x1b4   :  { %v672_v30 = vsel %vm640_vm3, %v624_v27, %v656_v28 }
 0x1b5   :  { %v931_v31 = vpack.c.bf16 %v672_v30, %v671_v29  ;;  %v386_v32 = vpop.f32.mrf.mxu3 }
 0x1b7   :  { %963 = vst [vmem:[%s1219_s6 + $0x8] sm:$0xff] %v931_v31   ;;  %v359_v33 = vpop.f32.mrf.mxu1  ;;  %v591_v31 = vadd.f32 %v1171_v3, %v590_v25 }
 0x1b8   :  { %v625_v36 = vadd.f32 %v576_v34, %v359_v33 }
 0x1ba   :  { %v657_v40 = vmul.f32 0.1, %v625_v36  ;;  %vm641_vm4 = vcmp.ge.f32.partialorder %v625_v36, 0.0 }
 0x1bc   :  { %v673_v45 = vsel %vm641_vm4, %v625_v36, %v657_v40 }
 0x1bd   :  { %v595_v37 = vpop.f32.mrf.mxu3 }
 0x1be   :  { %v596_v41 = vadd.f32 %v1171_v3, %v595_v37 }
 0x1bf   :  { %v361_v39 = vpop.f32.mrf.mxu1 }
 0x1c0   :  { %v626_v42 = vadd.f32 %v578_v38, %v361_v39  ;;  %v633_v46 = vadd.f32 %v596_v41, %v379_v8 }
 0x1c2   :  { %vm642_vm5 = vcmp.ge.f32.partialorder %v626_v42, 0.0  ;;  %v658_v43 = vmul.f32 0.1, %v626_v42  ;;  %v665_v53 = vmul.f32 0.1, %v633_v46  ;;  %vm649_vm6 = vcmp.ge.f32.partialorder %v633_v46, 0.0 }
 0x1c4   :  { %v674_v47 = vsel %vm642_vm5, %v626_v42, %v658_v43  ;;  %v681_v56 = vsel %vm649_vm6, %v633_v46, %v665_v53 }
 0x1c5   :  { %v936_v48 = vpack.c.bf16 %v674_v47, %v673_v45  ;;  %v597_v49 = vpop.f32.mrf.mxu3 }
 0x1c6   :  { %v598_v50 = vadd.f32 %v1171_v3, %v597_v49 }
 0x1c7   :  { %964 = vst [vmem:[%s1219_s6 + $0x10] sm:$0xff] %v936_v48   ;;  %v364_v51 = vpop.f32.mrf.mxu1 }
 0x1c8   :  { %v634_v54 = vadd.f32 %v598_v50, %v381_v17  ;;  %v627_v58 = vadd.f32 %v581_v52, %v364_v51 }
 0x1ca   :  { %vm650_vm7 = vcmp.ge.f32.partialorder %v634_v54, 0.0  ;;  %v666_v55 = vmul.f32 0.1, %v634_v54  ;;  %v659_v0 = vmul.f32 0.1, %v627_v58  ;;  %vm643_vm8 = vcmp.ge.f32.partialorder %v627_v58, 0.0 }
 0x1cc   :  { %v682_v57 = vsel %vm650_vm7, %v634_v54, %v666_v55  ;;  %v675_v5 = vsel %vm643_vm8, %v627_v58, %v659_v0 }
 0x1cd   :  { %v956_v59 = vpack.c.bf16 %v682_v57, %v681_v56  ;;  %v600_v61 = vpop.f32.mrf.mxu3 }
 0x1ce   :  { %v601_v1 = vadd.f32 %v1171_v3, %v600_v61 }
 0x1cf   :  { %968 = vst [vmem:[%s1219_s6 + $0x30] sm:$0xff] %v956_v59   ;;  %v366_v63 = vpop.f32.mrf.mxu1 }
 0x1d0   :  { %v628_v2 = vadd.f32 %v583_v62, %v366_v63  ;;  %v635_v6 = vadd.f32 %v601_v1, %v384_v22 }
 0x1d2   :  { %vm644_vm9 = vcmp.ge.f32.partialorder %v628_v2, 0.0  ;;  %v660_v4 = vmul.f32 0.1, %v628_v2  ;;  %v667_v14 = vmul.f32 0.1, %v635_v6  ;;  %vm651_vm10 = vcmp.ge.f32.partialorder %v635_v6, 0.0 }
 0x1d4   :  { %v676_v7 = vsel %vm644_vm9, %v628_v2, %v660_v4  ;;  %v683_v17 = vsel %vm651_vm10, %v635_v6, %v667_v14 }
 0x1d5   :  { %v941_v8 = vpack.c.bf16 %v676_v7, %v675_v5  ;;  %v602_v9 = vpop.f32.mrf.mxu3 }
 0x1d6   :  { %v603_v10 = vadd.f32 %v1171_v3, %v602_v9 }
 0x1d7   :  { %965 = vst [vmem:[%s1219_s6 + $0x18] sm:$0xff] %v941_v8   ;;  %v369_v12 = vpop.f32.mrf.mxu1 }
 0x1d8   :  { %v636_v15 = vadd.f32 %v603_v10, %v386_v32  ;;  %v629_v19 = vadd.f32 %v586_v13, %v369_v12  ;;  %v592_v32 = vpop.f32.mrf.mxu2 }
 0x1d9   :  { %v593_v34 = vadd.f32 %v1171_v3, %v592_v32 }
 0x1da   :  { %vm652_vm11 = vcmp.ge.f32.partialorder %v636_v15, 0.0  ;;  %v668_v16 = vmul.f32 0.1, %v636_v15  ;;  %v661_v23 = vmul.f32 0.1, %v629_v19  ;;  %vm645_vm12 = vcmp.ge.f32.partialorder %v629_v19, 0.0 }
 0x1dc   :  { %v684_v18 = vsel %vm652_vm11, %v636_v15, %v668_v16  ;;  %v677_v27 = vsel %vm645_vm12, %v629_v19, %v661_v23 }
 0x1dd   :  { %v961_v20 = vpack.c.bf16 %v684_v18, %v683_v17 }
 0x1df   :  { %969 = vst [vmem:[%s1219_s6 + $0x38] sm:$0xff] %v961_v20   ;;  %v371_v22 = vpop.f32.mrf.mxu1 }
 0x1e0   :  { %v630_v24 = vadd.f32 %v588_v21, %v371_v22 }
 0x1e2   :  { %vm646_vm13 = vcmp.ge.f32.partialorder %v630_v24, 0.0  ;;  %v662_v26 = vmul.f32 0.1, %v630_v24 }
 0x1e4   :  { %v678_v28 = vsel %vm646_vm13, %v630_v24, %v662_v26 }
 0x1e5   :  { %v946_v29 = vpack.c.bf16 %v678_v28, %v677_v27 }
 0x1e7   :  { %966 = vst [vmem:[%s1219_s6 + $0x20] sm:$0xff] %v946_v29   ;;  %v374_v30 = vpop.f32.mrf.mxu1 }
 0x1e8   :  { %v631_v33 = vadd.f32 %v591_v31, %v374_v30 }
 0x1ea   :  { %v663_v36 = vmul.f32 0.1, %v631_v33  ;;  %vm647_vm14 = vcmp.ge.f32.partialorder %v631_v33, 0.0 }
 0x1ec   :  { %v679_v39 = vsel %vm647_vm14, %v631_v33, %v663_v36 }
 0x1ef   :  { %v376_v35 = vpop.f32.mrf.mxu1 }
 0x1f0   :  { %v632_v37 = vadd.f32 %v593_v34, %v376_v35 }
 0x1f2   :  { %vm648_vm15 = vcmp.ge.f32.partialorder %v632_v37, 0.0  ;;  %v664_v38 = vmul.f32 0.1, %v632_v37 }
 0x1f4   :  { %v680_v40 = vsel %vm648_vm15, %v632_v37, %v664_v38 }
 0x1f5   :  { %v951_v41 = vpack.c.bf16 %v680_v40, %v679_v39 }
 0x1f7   :  { %967 = vst [vmem:[%s1219_s6 + $0x28] sm:$0xff] %v951_v41  }
 0x1f8   :  { %721 = vsyncpa [#allocation4], 1 }
 0x1f9   :  { %722 = vsyncpa [#allocation6], 1 }

// kernel: gcn_forward.10
= control target key start
LH: loop header
LB: loop body
LE: loop exit
PB: predicated region body
PF: predicated region fallthrough
CT: control target
= control target key end

     0   :  { %11 = vsyncpa [#allocation4], 0  ;;  %s1233_s0 = inlined_call_operand.hbm [shape: bf16[128,128], index: 0, kind: input, shape index: {}]   ;;  %s1234_s1 = inlined_call_operand.vmem [shape: bf16[128,128], index: 1, kind: input, shape index: {}, may-alias: {1,2}]   ;;  %s1235_s2 = inlined_call_operand.vmem [shape: bf16[128,128], index: 2, kind: input, shape index: {}, may-alias: {1,2}]   ;;  %s1236_s3 = inlined_call_operand.hbm [shape: bf16[128,128], index: 3, kind: input, shape index: {}]   ;;  %s1237_s4 = inlined_call_operand.hbm [shape: bf16[128,128], index: 4, kind: input, shape index: {}]   ;;  %s1238_s5 = inlined_call_operand.vmem [shape: f32[1,128], index: 5, kind: input, shape index: {}]   ;;  %s1239_s6 = inlined_call_operand.vmem [shape: bf16[128,128], index: 6, kind: output, shape index: {}]  }
   0x1   :  { %12 = vsyncpa [#allocation6], 0  ;;  %s34_s23 = sshll.u32 %s1236_s3, 4  ;;  %s1091_s24 = smov [#allocation5]   ;;  %s35_s23 = int_to_ptr.hbm [resolvable:$true] %s34_s23 }
   0x2   :  { %s36_s25 = sshll.u32 %s1091_s24, 4  ;;  %s17_s28 = sshll.u32 %s1233_s0, 4  ;;  %s37_s25 = int_to_ptr.vmem [resolvable:$true] %s36_s25  ;;  %s18_s28 = int_to_ptr.hbm [resolvable:$true] %s17_s28 }
   0x3   :  { %s1092_s29 = smov 64   ;;  %s1093_s30 = smov 4  }
   0x4   :  { %42 = dma.hbm_to_vmem [thread:$0]  %s35_s23, 1024, %s37_s25, [#allocation6], %s1092_s29, %s1092_s29, %s1093_s30  }
   0x5   :  { %s1094_s7 = smov [#allocation3]   ;;  %s47_s11 = sshll.u32 %s1237_s4, 4  ;;  %s48_s11 = int_to_ptr.hbm [resolvable:$true] %s47_s11 }
   0x6   :  { %s19_s8 = sshll.u32 %s1094_s7, 4  ;;  %s1095_s3 = smov [#allocation7]   ;;  %s20_s8 = int_to_ptr.vmem [resolvable:$true] %s19_s8 }
   0x7   :  { %25 = dma.hbm_to_vmem [thread:$0]  %s18_s28, 1024, %s20_s8, [#allocation4], %s1092_s29, %s1092_s29, %s1093_s30  }
   0x8   :  { %s49_s12 = sshll.u32 %s1095_s3, 4  ;;  %s50_s12 = int_to_ptr.vmem [resolvable:$true] %s49_s12 }
   0x9   :  { %55 = dma.hbm_to_vmem [thread:$0]  %s48_s11, 1024, %s50_s12, [#allocation6], %s1092_s29, %s1092_s29, %s1093_s30  }
   0xa   :  { %1087 = dma.done.wait [#allocation4], 1024  }
   0xb   :  { %1088 = vsyncadd [#allocation4], 4294966272 }
   0xc   :  { %1089 = dma.done.wait [#allocation6], 2048  }
   0xd   :  { %1090 = vsyncadd [#allocation6], 4294965248  ;;  %v913_v0 = vld [vmem:[#allocation5 + $0x38] sm:$0xff]  ;;  %v912_v1 = vld [vmem:[#allocation5 + $0x30] sm:$0xff] }
   0xe   :  { %218 = vmatpush.bf16.msra.mxu0 %v913_v0  ;;  %985 = vmatpush.bf16.msra.mxu3 %v913_v0  ;;  %v911_v2 = vld [vmem:[#allocation5 + $0x28] sm:$0xff]  ;;  %v910_v3 = vld [vmem:[#allocation5 + $0x20] sm:$0xff]  ;;  %v909_v4 = vld [vmem:[#allocation5 + $0x18] sm:$0xff] }
   0xf   :  { %v908_v5 = vld [vmem:[#allocation5 + $0x10] sm:$0xff]  ;;  %v907_v6 = vld [vmem:[#allocation5 + $0x8] sm:$0xff]  ;;  %v906_v7 = vld [vmem:[#allocation5] sm:$0xff] }
  0x10   :  { %v898_v8 = vld [vmem:[%s1234_s1] sm:$0xff]  ;;  %v904_v9 = vld [vmem:[%s1234_s1 + $0x30] sm:$0xff]  ;;  %v899_v10 = vld [vmem:[%s1234_s1 + $0x8] sm:$0xff] }
  0x11   :  { %v905_v11 = vld [vmem:[%s1234_s1 + $0x38] sm:$0xff]  ;;  %v900_v12 = vld [vmem:[%s1234_s1 + $0x10] sm:$0xff]  ;;  %v902_v14 = vld [vmem:[%s1234_s1 + $0x20] sm:$0xff] }
  0x12   :  { %219 = vmatpush.bf16.msra.mxu0 %v912_v1  ;;  %986 = vmatpush.bf16.msra.mxu3 %v912_v1  ;;  %v901_v13 = vld [vmem:[%s1234_s1 + $0x18] sm:$0xff]  ;;  %v903_v15 = vld [vmem:[%s1234_s1 + $0x28] sm:$0xff]  ;;  %v936_v30 = vld [vmem:[#allocation7 + $0x30] sm:$0xff] }
  0x13   :  { %v937_v28 = vld [vmem:[#allocation7 + $0x38] sm:$0xff]  ;;  %v935_v32 = vld [vmem:[#allocation7 + $0x28] sm:$0xff]  ;;  %v934_v33 = vld [vmem:[#allocation7 + $0x20] sm:$0xff] }
  0x14   :  { %571 = vmatpush.bf16.msra.mxu2 %v937_v28  ;;  %v933_v35 = vld [vmem:[#allocation7 + $0x18] sm:$0xff]  ;;  %v932_v36 = vld [vmem:[#allocation7 + $0x10] sm:$0xff]  ;;  %v931_v38 = vld [vmem:[#allocation7 + $0x8] sm:$0xff] }
  0x15   :  { %v930_v39 = vld [vmem:[#allocation7] sm:$0xff]  ;;  %v923_v44 = vld [vmem:[%s1235_s2 + $0x8] sm:$0xff]  ;;  %v924_v48 = vld [vmem:[%s1235_s2 + $0x10] sm:$0xff] }
  0x16   :  { %220 = vmatpush.bf16.msra.mxu0 %v911_v2  ;;  %987 = vmatpush.bf16.msra.mxu3 %v911_v2  ;;  %v922_v40 = vld [vmem:[%s1235_s2] sm:$0xff]  ;;  %v920_v52 = vld [vmem:[#allocation3 + $0x30] sm:$0xff]  ;;  %v925_v53 = vld [vmem:[%s1235_s2 + $0x18] sm:$0xff] }
  0x17   :  { %v914_v51 = vld [vmem:[#allocation3] sm:$0xff]  ;;  %v915_v54 = vld [vmem:[#allocation3 + $0x8] sm:$0xff]  ;;  %v921_v55 = vld [vmem:[#allocation3 + $0x38] sm:$0xff] }
  0x18   :  { %572 = vmatpush.bf16.msra.mxu2 %v936_v30  ;;  %v926_v56 = vld [vmem:[%s1235_s2 + $0x20] sm:$0xff]  ;;  %v916_v57 = vld [vmem:[#allocation3 + $0x10] sm:$0xff]  ;;  %v927_v59 = vld [vmem:[%s1235_s2 + $0x28] sm:$0xff] }
  0x19   :  { %v928_v58 = vld [vmem:[%s1235_s2 + $0x30] sm:$0xff]  ;;  %v917_v60 = vld [vmem:[#allocation3 + $0x18] sm:$0xff]  ;;  %v918_v62 = vld [vmem:[#allocation3 + $0x20] sm:$0xff] }
  0x1a   :  { %221 = vmatpush.bf16.msra.mxu0 %v910_v3  ;;  %988 = vmatpush.bf16.msra.mxu3 %v910_v3  ;;  %v929_v61 = vld [vmem:[%s1235_s2 + $0x38] sm:$0xff]  ;;  %v919_v63 = vld [vmem:[#allocation3 + $0x28] sm:$0xff]  ;;  %v1191_v3 = vld [vmem:[%s1238_s5] ss:$0 sm:$0xff] }
  0x1c   :  { %573 = vmatpush.bf16.msra.mxu2 %v935_v32 }
  0x1e   :  { %222 = vmatpush.bf16.msra.mxu0 %v909_v4  ;;  %989 = vmatpush.bf16.msra.mxu3 %v909_v4 }
  0x20   :  { %574 = vmatpush.bf16.msra.mxu2 %v934_v33 }
  0x22   :  { %223 = vmatpush.bf16.msra.mxu0 %v908_v5  ;;  %990 = vmatpush.bf16.msra.mxu3 %v908_v5 }
  0x24   :  { %575 = vmatpush.bf16.msra.mxu2 %v933_v35 }
  0x26   :  { %224 = vmatpush.bf16.msra.mxu0 %v907_v6  ;;  %991 = vmatpush.bf16.msra.mxu3 %v907_v6 }
  0x28   :  { %576 = vmatpush.bf16.msra.mxu2 %v932_v36 }
  0x2a   :  { %225 = vmatpush.bf16.msra.mxu0 %v906_v7  ;;  %992 = vmatpush.bf16.msra.mxu3 %v906_v7 }
  0x2c   :  { %577 = vmatpush.bf16.msra.mxu2 %v931_v38 }
  0x2d   :  { %226 = vmatmul.bf16.vlgmr.msra.gmra.mxu0 %v898_v8  ;;  %256 = vmatmul.bf16.vlgmr.msra.gmra.mxu3 %v904_v9 }
  0x30   :  { %578 = vmatpush.bf16.msra.mxu2 %v930_v39 }
  0x33   :  { %579 = vmatmul.bf16.vlgmr.msra.gmra.mxu2 %v922_v40 }
  0x3d   :  { %231 = vmatmul.bf16.gmra.mxu0 %v899_v10  ;;  %261 = vmatmul.bf16.gmra.mxu3 %v905_v11 }
  0x43   :  { %584 = vmatmul.bf16.gmra.mxu2 %v923_v44 }
  0x4d   :  { %236 = vmatmul.bf16.gmra.mxu0 %v900_v12 }
  0x53   :  { %589 = vmatmul.bf16.gmra.mxu2 %v924_v48 }
  0x5d   :  { %241 = vmatmul.bf16.gmra.mxu0 %v901_v13 }
  0x63   :  { %594 = vmatmul.bf16.gmra.mxu2 %v925_v53 }
  0x6d   :  { %246 = vmatmul.bf16.gmra.mxu0 %v902_v14 }
  0x73   :  { %599 = vmatmul.bf16.gmra.mxu2 %v926_v56 }
  0x7d   :  { %251 = vmatmul.bf16.gmra.mxu0 %v903_v15 }
  0x83   :  { %604 = vmatmul.bf16.gmra.mxu2 %v927_v59 }
  0xaa   :  { %v227_v16 = vpop.f32.mrf.mxu0 }
  0xb0   :  { %v257_v17 = vpop.f32.mrf.mxu3 }
  0xb2   :  { %v229_v18 = vpop.f32.mrf.mxu0 }
  0xb3   :  { %v267_v19 = vpack.c.bf16 %v229_v18, %v227_v16 }
  0xb6   :  { %v580_v0 = vpop.f32.mrf.mxu2 }
  0xb7   :  { %v581_v5 = vadd.f32 %v1191_v3, %v580_v0 }
  0xb8   :  { %v259_v20 = vpop.f32.mrf.mxu3 }
  0xb9   :  { %v273_v29 = vpack.c.bf16 %v259_v20, %v257_v17 }
  0xba   :  { %v232_v21 = vpop.f32.mrf.mxu0 }
  0xbe   :  { %v582_v1 = vpop.f32.mrf.mxu2 }
  0xbf   :  { %v583_v9 = vadd.f32 %v1191_v3, %v582_v1 }
  0xc0   :  { %v262_v22 = vpop.f32.mrf.mxu3 }
  0xc2   :  { %v234_v23 = vpop.f32.mrf.mxu0 }
  0xc3   :  { %v268_v24 = vpack.c.bf16 %v234_v23, %v232_v21 }
  0xc6   :  { %v585_v2 = vpop.f32.mrf.mxu2 }
  0xc7   :  { %v586_v20 = vadd.f32 %v1191_v3, %v585_v2 }
  0xc8   :  { %v264_v25 = vpop.f32.mrf.mxu3 }
  0xc9   :  { %v274_v26 = vpack.c.bf16 %v264_v25, %v262_v22 }
  0xca   :  { %v237_v27 = vpop.f32.mrf.mxu0 }
  0xcb   :  { %355 = vmatpush.bf16.msra.mxu1 %v274_v26  ;;  %993 = vmatpush.bf16.msrb.mxu3 %v274_v26 }
  0xce   :  { %v587_v6 = vpop.f32.mrf.mxu2 }
  0xcf   :  { %356 = vmatpush.bf16.msra.mxu1 %v273_v29  ;;  %994 = vmatpush.bf16.msrb.mxu3 %v273_v29  ;;  %v588_v23 = vadd.f32 %v1191_v3, %v587_v6 }
  0xd2   :  { %v239_v31 = vpop.f32.mrf.mxu0 }
  0xd3   :  { %v269_v50 = vpack.c.bf16 %v239_v31, %v237_v27 }
  0xd6   :  { %v590_v18 = vpop.f32.mrf.mxu2 }
  0xda   :  { %v242_v34 = vpop.f32.mrf.mxu0 }
  0xde   :  { %v592_v25 = vpop.f32.mrf.mxu2 }
  0xe2   :  { %v244_v37 = vpop.f32.mrf.mxu0 }
  0xe3   :  { %v270_v49 = vpack.c.bf16 %v244_v37, %v242_v34  ;;  %v591_v34 = vadd.f32 %v1191_v3, %v590_v18 }
  0xea   :  { %v247_v41 = vpop.f32.mrf.mxu0 }
  0xf2   :  { %v249_v42 = vpop.f32.mrf.mxu0 }
  0xf3   :  { %v271_v47 = vpack.c.bf16 %v249_v42, %v247_v41 }
  0xfa   :  { %v252_v43 = vpop.f32.mrf.mxu0 }
 0x102   :  { %v254_v45 = vpop.f32.mrf.mxu0 }
 0x103   :  { %v272_v46 = vpack.c.bf16 %v254_v45, %v252_v43 }
 0x105   :  { %357 = vmatpush.bf16.msra.mxu1 %v272_v46  ;;  %995 = vmatpush.bf16.msrb.mxu3 %v272_v46 }
 0x109   :  { %358 = vmatpush.bf16.msra.mxu1 %v271_v47  ;;  %996 = vmatpush.bf16.msrb.mxu3 %v271_v47 }
 0x10d   :  { %359 = vmatpush.bf16.msra.mxu1 %v270_v49  ;;  %997 = vmatpush.bf16.msrb.mxu3 %v270_v49 }
 0x111   :  { %360 = vmatpush.bf16.msra.mxu1 %v269_v50  ;;  %998 = vmatpush.bf16.msrb.mxu3 %v269_v50 }
 0x115   :  { %361 = vmatpush.bf16.msra.mxu1 %v268_v24  ;;  %999 = vmatpush.bf16.msrb.mxu3 %v268_v24 }
 0x119   :  { %362 = vmatpush.bf16.msra.mxu1 %v267_v19  ;;  %1000 = vmatpush.bf16.msrb.mxu3 %v267_v19 }
 0x11c   :  { %363 = vmatmul.bf16.vlgmr.msra.gmra.mxu1 %v914_v51  ;;  %393 = vmatmul.bf16.vlgmr.msrb.gmra.mxu3 %v920_v52 }
 0x11d   :  { %1001 = vmatpush.bf16.msra.mxu3 %v937_v28 }
 0x121   :  { %1002 = vmatpush.bf16.msra.mxu3 %v936_v30 }
 0x125   :  { %1003 = vmatpush.bf16.msra.mxu3 %v935_v32 }
 0x129   :  { %1004 = vmatpush.bf16.msra.mxu3 %v934_v33 }
 0x12c   :  { %368 = vmatmul.bf16.gmra.mxu1 %v915_v54  ;;  %398 = vmatmul.bf16.gmra.mxu3 %v921_v55 }
 0x12d   :  { %1005 = vmatpush.bf16.msra.mxu3 %v933_v35  ;;  %v595_v35 = vpop.f32.mrf.mxu2 }
 0x12e   :  { %v596_v52 = vadd.f32 %v1191_v3, %v595_v35 }
 0x131   :  { %1006 = vmatpush.bf16.msra.mxu3 %v932_v36 }
 0x135   :  { %1007 = vmatpush.bf16.msra.mxu3 %v931_v38  ;;  %v593_v38 = vadd.f32 %v1191_v3, %v592_v25  ;;  %v597_v44 = vpop.f32.mrf.mxu2 }
 0x139   :  { %1008 = vmatpush.bf16.msra.mxu3 %v930_v39 }
 0x13c   :  { %373 = vmatmul.bf16.gmra.mxu1 %v916_v57  ;;  %609 = vmatmul.bf16.vlgmr.msra.gmra.mxu3 %v928_v58 }
 0x14c   :  { %378 = vmatmul.bf16.gmra.mxu1 %v917_v60  ;;  %614 = vmatmul.bf16.gmra.mxu3 %v929_v61  ;;  %v600_v60 = vpop.f32.mrf.mxu2 }
 0x15c   :  { %383 = vmatmul.bf16.gmra.mxu1 %v918_v62  ;;  %v598_v62 = vadd.f32 %v1191_v3, %v597_v44 }
 0x16c   :  { %388 = vmatmul.bf16.gmra.mxu1 %v919_v63 }
 0x199   :  { %v364_v4 = vpop.f32.mrf.mxu1 }
 0x19a   :  { %v636_v7 = vadd.f32 %v581_v5, %v364_v4 }
 0x19c   :  { %v668_v11 = vmul.f32 0.1, %v636_v7  ;;  %vm652_vm0 = vcmp.ge.f32.partialorder %v636_v7, 0.0 }
 0x19e   :  { %v684_v14 = vsel %vm652_vm0, %v636_v7, %v668_v11  ;;  %v602_v11 = vpop.f32.mrf.mxu2 }
 0x19f   :  { %v394_v8 = vpop.f32.mrf.mxu3 }
 0x1a1   :  { %v366_v10 = vpop.f32.mrf.mxu1 }
 0x1a2   :  { %v637_v12 = vadd.f32 %v583_v9, %v366_v10 }
 0x1a4   :  { %vm653_vm1 = vcmp.ge.f32.partialorder %v637_v12, 0.0  ;;  %v669_v13 = vmul.f32 0.1, %v637_v12 }
 0x1a6   :  { %v685_v15 = vsel %vm653_vm1, %v637_v12, %v669_v13  ;;  %v601_v13 = vadd.f32 %v1191_v3, %v600_v60  ;;  %v605_v25 = vpop.f32.mrf.mxu2 }
 0x1a7   :  { %v941_v16 = vpack.c.bf16 %v685_v15, %v684_v14  ;;  %v396_v17 = vpop.f32.mrf.mxu3 }
 0x1a9   :  { %942 = vst [vmem:[%s1239_s6] sm:$0xff] %v941_v16   ;;  %v369_v19 = vpop.f32.mrf.mxu1 }
 0x1aa   :  { %v638_v21 = vadd.f32 %v586_v20, %v369_v19 }
 0x1ac   :  { %v670_v26 = vmul.f32 0.1, %v638_v21  ;;  %vm654_vm2 = vcmp.ge.f32.partialorder %v638_v21, 0.0 }
 0x1ae   :  { %v686_v29 = vsel %vm654_vm2, %v638_v21, %v670_v26  ;;  %v603_v21 = vadd.f32 %v1191_v3, %v602_v11 }
 0x1af   :  { %v399_v22 = vpop.f32.mrf.mxu3 }
 0x1b1   :  { %v371_v24 = vpop.f32.mrf.mxu1 }
 0x1b2   :  { %v639_v27 = vadd.f32 %v588_v23, %v371_v24 }
 0x1b4   :  { %vm655_vm3 = vcmp.ge.f32.partialorder %v639_v27, 0.0  ;;  %v671_v28 = vmul.f32 0.1, %v639_v27 }
 0x1b6   :  { %v687_v30 = vsel %vm655_vm3, %v639_v27, %v671_v28 }
 0x1b7   :  { %v946_v31 = vpack.c.bf16 %v687_v30, %v686_v29  ;;  %v401_v32 = vpop.f32.mrf.mxu3 }
 0x1b9   :  { %978 = vst [vmem:[%s1239_s6 + $0x8] sm:$0xff] %v946_v31   ;;  %v374_v33 = vpop.f32.mrf.mxu1  ;;  %v606_v31 = vadd.f32 %v1191_v3, %v605_v25 }
 0x1ba   :  { %v640_v36 = vadd.f32 %v591_v34, %v374_v33 }
 0x1bc   :  { %v672_v40 = vmul.f32 0.1, %v640_v36  ;;  %vm656_vm4 = vcmp.ge.f32.partialorder %v640_v36, 0.0 }
 0x1be   :  { %v688_v45 = vsel %vm656_vm4, %v640_v36, %v672_v40 }
 0x1bf   :  { %v610_v37 = vpop.f32.mrf.mxu3 }
 0x1c0   :  { %v611_v41 = vadd.f32 %v1191_v3, %v610_v37 }
 0x1c1   :  { %v376_v39 = vpop.f32.mrf.mxu1 }
 0x1c2   :  { %v641_v42 = vadd.f32 %v593_v38, %v376_v39  ;;  %v648_v46 = vadd.f32 %v611_v41, %v394_v8 }
 0x1c4   :  { %vm657_vm5 = vcmp.ge.f32.partialorder %v641_v42, 0.0  ;;  %v673_v43 = vmul.f32 0.1, %v641_v42  ;;  %v680_v53 = vmul.f32 0.1, %v648_v46  ;;  %vm664_vm6 = vcmp.ge.f32.partialorder %v648_v46, 0.0 }
 0x1c6   :  { %v689_v47 = vsel %vm657_vm5, %v641_v42, %v673_v43  ;;  %v696_v56 = vsel %vm664_vm6, %v648_v46, %v680_v53 }
 0x1c7   :  { %v951_v48 = vpack.c.bf16 %v689_v47, %v688_v45  ;;  %v612_v49 = vpop.f32.mrf.mxu3 }
 0x1c8   :  { %v613_v50 = vadd.f32 %v1191_v3, %v612_v49 }
 0x1c9   :  { %979 = vst [vmem:[%s1239_s6 + $0x10] sm:$0xff] %v951_v48   ;;  %v379_v51 = vpop.f32.mrf.mxu1 }
 0x1ca   :  { %v649_v54 = vadd.f32 %v613_v50, %v396_v17  ;;  %v642_v58 = vadd.f32 %v596_v52, %v379_v51 }
 0x1cc   :  { %vm665_vm7 = vcmp.ge.f32.partialorder %v649_v54, 0.0  ;;  %v681_v55 = vmul.f32 0.1, %v649_v54  ;;  %v674_v0 = vmul.f32 0.1, %v642_v58  ;;  %vm658_vm8 = vcmp.ge.f32.partialorder %v642_v58, 0.0 }
 0x1ce   :  { %v697_v57 = vsel %vm665_vm7, %v649_v54, %v681_v55  ;;  %v690_v5 = vsel %vm658_vm8, %v642_v58, %v674_v0 }
 0x1cf   :  { %v971_v59 = vpack.c.bf16 %v697_v57, %v696_v56  ;;  %v615_v61 = vpop.f32.mrf.mxu3 }
 0x1d0   :  { %v616_v1 = vadd.f32 %v1191_v3, %v615_v61 }
 0x1d1   :  { %983 = vst [vmem:[%s1239_s6 + $0x30] sm:$0xff] %v971_v59   ;;  %v381_v63 = vpop.f32.mrf.mxu1 }
 0x1d2   :  { %v643_v2 = vadd.f32 %v598_v62, %v381_v63  ;;  %v650_v6 = vadd.f32 %v616_v1, %v399_v22 }
 0x1d4   :  { %vm659_vm9 = vcmp.ge.f32.partialorder %v643_v2, 0.0  ;;  %v675_v4 = vmul.f32 0.1, %v643_v2  ;;  %v682_v14 = vmul.f32 0.1, %v650_v6  ;;  %vm666_vm10 = vcmp.ge.f32.partialorder %v650_v6, 0.0 }
 0x1d6   :  { %v691_v7 = vsel %vm659_vm9, %v643_v2, %v675_v4  ;;  %v698_v17 = vsel %vm666_vm10, %v650_v6, %v682_v14 }
 0x1d7   :  { %v956_v8 = vpack.c.bf16 %v691_v7, %v690_v5  ;;  %v617_v9 = vpop.f32.mrf.mxu3 }
 0x1d8   :  { %v618_v10 = vadd.f32 %v1191_v3, %v617_v9 }
 0x1d9   :  { %980 = vst [vmem:[%s1239_s6 + $0x18] sm:$0xff] %v956_v8   ;;  %v384_v12 = vpop.f32.mrf.mxu1 }
 0x1da   :  { %v651_v15 = vadd.f32 %v618_v10, %v401_v32  ;;  %v644_v19 = vadd.f32 %v601_v13, %v384_v12  ;;  %v607_v32 = vpop.f32.mrf.mxu2 }
 0x1db   :  { %v608_v34 = vadd.f32 %v1191_v3, %v607_v32 }
 0x1dc   :  { %vm667_vm11 = vcmp.ge.f32.partialorder %v651_v15, 0.0  ;;  %v683_v16 = vmul.f32 0.1, %v651_v15  ;;  %v676_v23 = vmul.f32 0.1, %v644_v19  ;;  %vm660_vm12 = vcmp.ge.f32.partialorder %v644_v19, 0.0 }
 0x1de   :  { %v699_v18 = vsel %vm667_vm11, %v651_v15, %v683_v16  ;;  %v692_v27 = vsel %vm660_vm12, %v644_v19, %v676_v23 }
 0x1df   :  { %v976_v20 = vpack.c.bf16 %v699_v18, %v698_v17 }
 0x1e1   :  { %984 = vst [vmem:[%s1239_s6 + $0x38] sm:$0xff] %v976_v20   ;;  %v386_v22 = vpop.f32.mrf.mxu1 }
 0x1e2   :  { %v645_v24 = vadd.f32 %v603_v21, %v386_v22 }
 0x1e4   :  { %vm661_vm13 = vcmp.ge.f32.partialorder %v645_v24, 0.0  ;;  %v677_v26 = vmul.f32 0.1, %v645_v24 }
 0x1e6   :  { %v693_v28 = vsel %vm661_vm13, %v645_v24, %v677_v26 }
 0x1e7   :  { %v961_v29 = vpack.c.bf16 %v693_v28, %v692_v27 }
 0x1e9   :  { %981 = vst [vmem:[%s1239_s6 + $0x20] sm:$0xff] %v961_v29   ;;  %v389_v30 = vpop.f32.mrf.mxu1 }
 0x1ea   :  { %v646_v33 = vadd.f32 %v606_v31, %v389_v30 }
 0x1ec   :  { %v678_v36 = vmul.f32 0.1, %v646_v33  ;;  %vm662_vm14 = vcmp.ge.f32.partialorder %v646_v33, 0.0 }
 0x1ee   :  { %v694_v39 = vsel %vm662_vm14, %v646_v33, %v678_v36 }
 0x1f1   :  { %v391_v35 = vpop.f32.mrf.mxu1 }
 0x1f2   :  { %v647_v37 = vadd.f32 %v608_v34, %v391_v35 }
 0x1f4   :  { %vm663_vm15 = vcmp.ge.f32.partialorder %v647_v37, 0.0  ;;  %v679_v38 = vmul.f32 0.1, %v647_v37 }
 0x1f6   :  { %v695_v40 = vsel %vm663_vm15, %v647_v37, %v679_v38 }
 0x1f7   :  { %v966_v41 = vpack.c.bf16 %v695_v40, %v694_v39 }
 0x1f9   :  { %982 = vst [vmem:[%s1239_s6 + $0x28] sm:$0xff] %v966_v41  }
 0x1fa   :  { %736 = vsyncpa [#allocation4], 1 }
 0x1fb   :  { %737 = vsyncpa [#allocation6], 1 }

// kernel: gcn_forward.11
= control target key start
LH: loop header
LB: loop body
LE: loop exit
PB: predicated region body
PF: predicated region fallthrough
CT: control target
= control target key end

     0   :  { %11 = vsyncpa [#allocation4], 0  ;;  %s1315_s0 = inlined_call_operand.hbm [shape: bf16[128,128], index: 0, kind: input, shape index: {}]   ;;  %s1316_s1 = inlined_call_operand.vmem [shape: bf16[128,128], index: 1, kind: input, shape index: {}, may-alias: {1,2}]   ;;  %s1317_s2 = inlined_call_operand.vmem [shape: bf16[128,128], index: 2, kind: input, shape index: {}, may-alias: {1,2}]   ;;  %s1318_s3 = inlined_call_operand.hbm [shape: bf16[128,128], index: 3, kind: input, shape index: {}]   ;;  %s1319_s4 = inlined_call_operand.hbm [shape: bf16[128,128], index: 4, kind: input, shape index: {}]   ;;  %s1320_s5 = inlined_call_operand.vmem [shape: f32[1,128], index: 5, kind: input, shape index: {}]   ;;  %s1321_s6 = inlined_call_operand.vmem [shape: f32[128,128], index: 6, kind: output, shape index: {}]  }
   0x1   :  { %12 = vsyncpa [#allocation6], 0  ;;  %s34_s23 = sshll.u32 %s1318_s3, 4  ;;  %s1140_s24 = smov [#allocation5]   ;;  %s35_s23 = int_to_ptr.hbm [resolvable:$true] %s34_s23 }
   0x2   :  { %s36_s25 = sshll.u32 %s1140_s24, 4  ;;  %s17_s28 = sshll.u32 %s1315_s0, 4  ;;  %s37_s25 = int_to_ptr.vmem [resolvable:$true] %s36_s25  ;;  %s18_s28 = int_to_ptr.hbm [resolvable:$true] %s17_s28 }
   0x3   :  { %s1141_s29 = smov 64   ;;  %s1142_s30 = smov 4  }
   0x4   :  { %42 = dma.hbm_to_vmem [thread:$0]  %s35_s23, 1024, %s37_s25, [#allocation6], %s1141_s29, %s1141_s29, %s1142_s30  }
   0x5   :  { %s1143_s7 = smov [#allocation3]   ;;  %s47_s11 = sshll.u32 %s1319_s4, 4  ;;  %s48_s11 = int_to_ptr.hbm [resolvable:$true] %s47_s11 }
   0x6   :  { %s19_s8 = sshll.u32 %s1143_s7, 4  ;;  %s1144_s3 = smov [#allocation7]   ;;  %s20_s8 = int_to_ptr.vmem [resolvable:$true] %s19_s8 }
   0x7   :  { %25 = dma.hbm_to_vmem [thread:$0]  %s18_s28, 1024, %s20_s8, [#allocation4], %s1141_s29, %s1141_s29, %s1142_s30  }
   0x8   :  { %s49_s12 = sshll.u32 %s1144_s3, 4  ;;  %s50_s12 = int_to_ptr.vmem [resolvable:$true] %s49_s12 }
   0x9   :  { %55 = dma.hbm_to_vmem [thread:$0]  %s48_s11, 1024, %s50_s12, [#allocation6], %s1141_s29, %s1141_s29, %s1142_s30  }
   0xa   :  { %1136 = dma.done.wait [#allocation4], 1024  }
   0xb   :  { %1137 = vsyncadd [#allocation4], 4294966272 }
   0xc   :  { %1138 = dma.done.wait [#allocation6], 2048  }
   0xd   :  { %1139 = vsyncadd [#allocation6], 4294965248  ;;  %v945_v0 = vld [vmem:[#allocation5 + $0x38] sm:$0xff]  ;;  %v944_v1 = vld [vmem:[#allocation5 + $0x30] sm:$0xff] }
   0xe   :  { %218 = vmatpush.bf16.msra.mxu0 %v945_v0  ;;  %970 = vmatpush.bf16.msra.mxu3 %v945_v0  ;;  %v943_v2 = vld [vmem:[#allocation5 + $0x28] sm:$0xff]  ;;  %v942_v3 = vld [vmem:[#allocation5 + $0x20] sm:$0xff]  ;;  %v941_v4 = vld [vmem:[#allocation5 + $0x18] sm:$0xff] }
   0xf   :  { %v940_v5 = vld [vmem:[#allocation5 + $0x10] sm:$0xff]  ;;  %v939_v6 = vld [vmem:[#allocation5 + $0x8] sm:$0xff]  ;;  %v938_v7 = vld [vmem:[#allocation5] sm:$0xff] }
  0x10   :  { %v930_v8 = vld [vmem:[%s1316_s1] sm:$0xff]  ;;  %v936_v9 = vld [vmem:[%s1316_s1 + $0x30] sm:$0xff]  ;;  %v931_v10 = vld [vmem:[%s1316_s1 + $0x8] sm:$0xff] }
  0x11   :  { %v937_v11 = vld [vmem:[%s1316_s1 + $0x38] sm:$0xff]  ;;  %v932_v12 = vld [vmem:[%s1316_s1 + $0x10] sm:$0xff]  ;;  %v934_v14 = vld [vmem:[%s1316_s1 + $0x20] sm:$0xff] }
  0x12   :  { %219 = vmatpush.bf16.msra.mxu0 %v944_v1  ;;  %971 = vmatpush.bf16.msra.mxu3 %v944_v1  ;;  %v933_v13 = vld [vmem:[%s1316_s1 + $0x18] sm:$0xff]  ;;  %v935_v15 = vld [vmem:[%s1316_s1 + $0x28] sm:$0xff]  ;;  %v968_v30 = vld [vmem:[#allocation7 + $0x30] sm:$0xff] }
  0x13   :  { %v969_v28 = vld [vmem:[#allocation7 + $0x38] sm:$0xff]  ;;  %v967_v32 = vld [vmem:[#allocation7 + $0x28] sm:$0xff]  ;;  %v966_v33 = vld [vmem:[#allocation7 + $0x20] sm:$0xff] }
  0x14   :  { %571 = vmatpush.bf16.msra.mxu2 %v969_v28  ;;  %v965_v35 = vld [vmem:[#allocation7 + $0x18] sm:$0xff]  ;;  %v964_v36 = vld [vmem:[#allocation7 + $0x10] sm:$0xff]  ;;  %v963_v38 = vld [vmem:[#allocation7 + $0x8] sm:$0xff] }
  0x15   :  { %v962_v39 = vld [vmem:[#allocation7] sm:$0xff]  ;;  %v955_v44 = vld [vmem:[%s1317_s2 + $0x8] sm:$0xff]  ;;  %v956_v48 = vld [vmem:[%s1317_s2 + $0x10] sm:$0xff] }
  0x16   :  { %220 = vmatpush.bf16.msra.mxu0 %v943_v2  ;;  %972 = vmatpush.bf16.msra.mxu3 %v943_v2  ;;  %v954_v40 = vld [vmem:[%s1317_s2] sm:$0xff]  ;;  %v952_v52 = vld [vmem:[#allocation3 + $0x30] sm:$0xff]  ;;  %v957_v53 = vld [vmem:[%s1317_s2 + $0x18] sm:$0xff] }
  0x17   :  { %v946_v51 = vld [vmem:[#allocation3] sm:$0xff]  ;;  %v947_v54 = vld [vmem:[#allocation3 + $0x8] sm:$0xff]  ;;  %v953_v55 = vld [vmem:[#allocation3 + $0x38] sm:$0xff] }
  0x18   :  { %572 = vmatpush.bf16.msra.mxu2 %v968_v30  ;;  %v958_v56 = vld [vmem:[%s1317_s2 + $0x20] sm:$0xff]  ;;  %v948_v57 = vld [vmem:[#allocation3 + $0x10] sm:$0xff]  ;;  %v959_v59 = vld [vmem:[%s1317_s2 + $0x28] sm:$0xff] }
  0x19   :  { %v960_v58 = vld [vmem:[%s1317_s2 + $0x30] sm:$0xff]  ;;  %v949_v60 = vld [vmem:[#allocation3 + $0x18] sm:$0xff]  ;;  %v950_v62 = vld [vmem:[#allocation3 + $0x20] sm:$0xff] }
  0x1a   :  { %221 = vmatpush.bf16.msra.mxu0 %v942_v3  ;;  %973 = vmatpush.bf16.msra.mxu3 %v942_v3  ;;  %v961_v61 = vld [vmem:[%s1317_s2 + $0x38] sm:$0xff]  ;;  %v951_v63 = vld [vmem:[#allocation3 + $0x28] sm:$0xff]  ;;  %v1240_v2 = vld [vmem:[%s1320_s5] ss:$0 sm:$0xff] }
  0x1c   :  { %573 = vmatpush.bf16.msra.mxu2 %v967_v32 }
  0x1e   :  { %222 = vmatpush.bf16.msra.mxu0 %v941_v4  ;;  %974 = vmatpush.bf16.msra.mxu3 %v941_v4 }
  0x20   :  { %574 = vmatpush.bf16.msra.mxu2 %v966_v33 }
  0x22   :  { %223 = vmatpush.bf16.msra.mxu0 %v940_v5  ;;  %975 = vmatpush.bf16.msra.mxu3 %v940_v5 }
  0x24   :  { %575 = vmatpush.bf16.msra.mxu2 %v965_v35 }
  0x26   :  { %224 = vmatpush.bf16.msra.mxu0 %v939_v6  ;;  %976 = vmatpush.bf16.msra.mxu3 %v939_v6 }
  0x28   :  { %576 = vmatpush.bf16.msra.mxu2 %v964_v36 }
  0x2a   :  { %225 = vmatpush.bf16.msra.mxu0 %v938_v7  ;;  %977 = vmatpush.bf16.msra.mxu3 %v938_v7 }
  0x2c   :  { %577 = vmatpush.bf16.msra.mxu2 %v963_v38 }
  0x2d   :  { %226 = vmatmul.bf16.vlgmr.msra.gmra.mxu0 %v930_v8  ;;  %256 = vmatmul.bf16.vlgmr.msra.gmra.mxu3 %v936_v9 }
  0x30   :  { %578 = vmatpush.bf16.msra.mxu2 %v962_v39 }
  0x33   :  { %579 = vmatmul.bf16.vlgmr.msra.gmra.mxu2 %v954_v40 }
  0x3d   :  { %231 = vmatmul.bf16.gmra.mxu0 %v931_v10  ;;  %261 = vmatmul.bf16.gmra.mxu3 %v937_v11 }
  0x43   :  { %584 = vmatmul.bf16.gmra.mxu2 %v955_v44 }
  0x4d   :  { %236 = vmatmul.bf16.gmra.mxu0 %v932_v12 }
  0x53   :  { %589 = vmatmul.bf16.gmra.mxu2 %v956_v48 }
  0x5d   :  { %241 = vmatmul.bf16.gmra.mxu0 %v933_v13 }
  0x63   :  { %594 = vmatmul.bf16.gmra.mxu2 %v957_v53 }
  0x6d   :  { %246 = vmatmul.bf16.gmra.mxu0 %v934_v14 }
  0x73   :  { %599 = vmatmul.bf16.gmra.mxu2 %v958_v56 }
  0x7d   :  { %251 = vmatmul.bf16.gmra.mxu0 %v935_v15 }
  0x83   :  { %604 = vmatmul.bf16.gmra.mxu2 %v959_v59 }
  0xaa   :  { %v227_v16 = vpop.f32.mrf.mxu0 }
  0xb0   :  { %v257_v17 = vpop.f32.mrf.mxu3 }
  0xb2   :  { %v229_v18 = vpop.f32.mrf.mxu0 }
  0xb3   :  { %v267_v19 = vpack.c.bf16 %v229_v18, %v227_v16 }
  0xb6   :  { %v580_v0 = vpop.f32.mrf.mxu2 }
  0xb7   :  { %v581_v4 = vadd.f32 %v1240_v2, %v580_v0 }
  0xb8   :  { %v259_v20 = vpop.f32.mrf.mxu3 }
  0xb9   :  { %v273_v29 = vpack.c.bf16 %v259_v20, %v257_v17 }
  0xba   :  { %v232_v21 = vpop.f32.mrf.mxu0 }
  0xbe   :  { %v582_v1 = vpop.f32.mrf.mxu2 }
  0xbf   :  { %v583_v11 = vadd.f32 %v1240_v2, %v582_v1 }
  0xc0   :  { %v262_v22 = vpop.f32.mrf.mxu3 }
  0xc2   :  { %v234_v23 = vpop.f32.mrf.mxu0 }
  0xc3   :  { %v268_v24 = vpack.c.bf16 %v234_v23, %v232_v21 }
  0xc6   :  { %v585_v3 = vpop.f32.mrf.mxu2 }
  0xc7   :  { %v586_v16 = vadd.f32 %v1240_v2, %v585_v3 }
  0xc8   :  { %v264_v25 = vpop.f32.mrf.mxu3 }
  0xc9   :  { %v274_v26 = vpack.c.bf16 %v264_v25, %v262_v22 }
  0xca   :  { %v237_v27 = vpop.f32.mrf.mxu0 }
  0xcb   :  { %355 = vmatpush.bf16.msra.mxu1 %v274_v26  ;;  %978 = vmatpush.bf16.msrb.mxu3 %v274_v26 }
  0xce   :  { %v587_v8 = vpop.f32.mrf.mxu2 }
  0xcf   :  { %356 = vmatpush.bf16.msra.mxu1 %v273_v29  ;;  %979 = vmatpush.bf16.msrb.mxu3 %v273_v29 }
  0xd2   :  { %v239_v31 = vpop.f32.mrf.mxu0 }
  0xd3   :  { %v269_v50 = vpack.c.bf16 %v239_v31, %v237_v27 }
  0xd6   :  { %v590_v20 = vpop.f32.mrf.mxu2 }
  0xda   :  { %v242_v34 = vpop.f32.mrf.mxu0 }
  0xe2   :  { %v244_v37 = vpop.f32.mrf.mxu0 }
  0xe3   :  { %v270_v49 = vpack.c.bf16 %v244_v37, %v242_v34 }
  0xea   :  { %v247_v41 = vpop.f32.mrf.mxu0 }
  0xf2   :  { %v249_v42 = vpop.f32.mrf.mxu0 }
  0xf3   :  { %v271_v47 = vpack.c.bf16 %v249_v42, %v247_v41 }
  0xfa   :  { %v252_v43 = vpop.f32.mrf.mxu0 }
 0x102   :  { %v254_v45 = vpop.f32.mrf.mxu0 }
 0x103   :  { %v272_v46 = vpack.c.bf16 %v254_v45, %v252_v43 }
 0x105   :  { %357 = vmatpush.bf16.msra.mxu1 %v272_v46  ;;  %980 = vmatpush.bf16.msrb.mxu3 %v272_v46 }
 0x109   :  { %358 = vmatpush.bf16.msra.mxu1 %v271_v47  ;;  %981 = vmatpush.bf16.msrb.mxu3 %v271_v47 }
 0x10d   :  { %359 = vmatpush.bf16.msra.mxu1 %v270_v49  ;;  %982 = vmatpush.bf16.msrb.mxu3 %v270_v49 }
 0x111   :  { %360 = vmatpush.bf16.msra.mxu1 %v269_v50  ;;  %983 = vmatpush.bf16.msrb.mxu3 %v269_v50 }
 0x115   :  { %361 = vmatpush.bf16.msra.mxu1 %v268_v24  ;;  %984 = vmatpush.bf16.msrb.mxu3 %v268_v24 }
 0x119   :  { %362 = vmatpush.bf16.msra.mxu1 %v267_v19  ;;  %985 = vmatpush.bf16.msrb.mxu3 %v267_v19 }
 0x11c   :  { %363 = vmatmul.bf16.vlgmr.msra.gmra.mxu1 %v946_v51  ;;  %393 = vmatmul.bf16.vlgmr.msrb.gmra.mxu3 %v952_v52 }
 0x11d   :  { %986 = vmatpush.bf16.msra.mxu3 %v969_v28 }
 0x121   :  { %987 = vmatpush.bf16.msra.mxu3 %v968_v30  ;;  %v588_v30 = vadd.f32 %v1240_v2, %v587_v8 }
 0x125   :  { %988 = vmatpush.bf16.msra.mxu3 %v967_v32  ;;  %v592_v32 = vpop.f32.mrf.mxu2 }
 0x126   :  { %v593_v52 = vadd.f32 %v1240_v2, %v592_v32 }
 0x129   :  { %989 = vmatpush.bf16.msra.mxu3 %v966_v33 }
 0x12c   :  { %368 = vmatmul.bf16.gmra.mxu1 %v947_v54  ;;  %398 = vmatmul.bf16.gmra.mxu3 %v953_v55 }
 0x12d   :  { %990 = vmatpush.bf16.msra.mxu3 %v965_v35  ;;  %v595_v44 = vpop.f32.mrf.mxu2 }
 0x131   :  { %991 = vmatpush.bf16.msra.mxu3 %v964_v36  ;;  %v591_v36 = vadd.f32 %v1240_v2, %v590_v20 }
 0x135   :  { %992 = vmatpush.bf16.msra.mxu3 %v963_v38  ;;  %v597_v59 = vpop.f32.mrf.mxu2 }
 0x139   :  { %993 = vmatpush.bf16.msra.mxu3 %v962_v39 }
 0x13c   :  { %373 = vmatmul.bf16.gmra.mxu1 %v948_v57  ;;  %609 = vmatmul.bf16.vlgmr.msra.gmra.mxu3 %v960_v58 }
 0x14c   :  { %378 = vmatmul.bf16.gmra.mxu1 %v949_v60  ;;  %614 = vmatmul.bf16.gmra.mxu3 %v961_v61  ;;  %v596_v61 = vadd.f32 %v1240_v2, %v595_v44 }
 0x15c   :  { %383 = vmatmul.bf16.gmra.mxu1 %v950_v62 }
 0x16c   :  { %388 = vmatmul.bf16.gmra.mxu1 %v951_v63 }
 0x199   :  { %v364_v5 = vpop.f32.mrf.mxu1 }
 0x19a   :  { %v636_v6 = vadd.f32 %v581_v4, %v364_v5 }
 0x19c   :  { %v652_v7 = vsub.f32 0.0, %v636_v6 }
 0x19e   :  { %v668_v9 = vmul.f32 1.442695, %v652_v7 }
 0x19f   :  { %v394_v10 = vpop.f32.mrf.mxu3 }
 0x1a0   :  { %1000 = vpow2.f32 %v668_v9 }
 0x1a1   :  { %v366_v12 = vpop.f32.mrf.mxu1 }
 0x1a2   :  { %v637_v13 = vadd.f32 %v583_v11, %v366_v12 }
 0x1a4   :  { %v653_v14 = vsub.f32 0.0, %v637_v13 }
 0x1a6   :  { %v1001_v15 = vpop.eup %1000  ;;  %v670_v17 = vmul.f32 1.442695, %v653_v14 }
 0x1a7   :  { %v700_v18 = vadd.f32 1.0, %v1001_v15  ;;  %v1245_v19 = vpop.f32.mrf.mxu3 }
 0x1a8   :  { %1002 = vpow2.f32 %v670_v17 }
 0x1a9   :  { %1004 = vrcp.f32 %v700_v18  ;;  %v369_v21 = vpop.f32.mrf.mxu1 }
 0x1aa   :  { %v638_v22 = vadd.f32 %v586_v16, %v369_v21  ;;  %v600_v16 = vpop.f32.mrf.mxu2  ;;  %v598_v21 = vadd.f32 %v1240_v2, %v597_v59 }
 0x1ac   :  { %v654_v23 = vsub.f32 0.0, %v638_v22 }
 0x1ae   :  { %v1003_v24 = vpop.eup %1002  ;;  %v672_v25 = vmul.f32 1.442695, %v654_v23 }
 0x1af   :  { %v1005_v26 = vpop.eup %1004  ;;  %v701_v27 = vadd.f32 1.0, %v1003_v24  ;;  %v1247_v28 = vpop.f32.mrf.mxu3 }
 0x1b0   :  { %v732_v29 = vmin.f32 %v1005_v26, 1.0  ;;  %1006 = vpow2.f32 %v672_v25 }
 0x1b1   :  { %1008 = vrcp.f32 %v701_v27  ;;  %v371_v31 = vpop.f32.mrf.mxu1 }
 0x1b2   :  { %748 = vst [vmem:[%s1321_s6] sm:$0xff] %v732_v29  ;;  %v639_v33 = vadd.f32 %v588_v30, %v371_v31  ;;  %v601_v30 = vadd.f32 %v1240_v2, %v600_v16 }
 0x1b4   :  { %v655_v34 = vsub.f32 0.0, %v639_v33 }
 0x1b6   :  { %v1007_v35 = vpop.eup %1006  ;;  %v674_v37 = vmul.f32 1.442695, %v655_v34 }
 0x1b7   :  { %v1009_v38 = vpop.eup %1008  ;;  %v702_v39 = vadd.f32 1.0, %v1007_v35  ;;  %v1254_v40 = vpop.f32.mrf.mxu3 }
 0x1b8   :  { %v733_v41 = vmin.f32 %v1009_v38, 1.0  ;;  %1010 = vpow2.f32 %v674_v37 }
 0x1b9   :  { %1012 = vrcp.f32 %v702_v39  ;;  %v374_v42 = vpop.f32.mrf.mxu1 }
 0x1ba   :  { %749 = vst [vmem:[%s1321_s6 + $0x8] sm:$0xff] %v733_v41  ;;  %v640_v43 = vadd.f32 %v591_v36, %v374_v42  ;;  %v602_v41 = vpop.f32.mrf.mxu2 }
 0x1bc   :  { %v656_v45 = vsub.f32 0.0, %v640_v43 }
 0x1be   :  { %v1011_v46 = vpop.eup %1010  ;;  %v676_v47 = vmul.f32 1.442695, %v656_v45 }
 0x1bf   :  { %v1013_v48 = vpop.eup %1012  ;;  %v703_v49 = vadd.f32 1.0, %v1011_v46  ;;  %v610_v50 = vpop.f32.mrf.mxu3 }
 0x1c0   :  { %v734_v51 = vmin.f32 %v1013_v48, 1.0  ;;  %1014 = vpow2.f32 %v676_v47  ;;  %v611_v53 = vadd.f32 %v1240_v2, %v610_v50 }
 0x1c1   :  { %1016 = vrcp.f32 %v703_v49  ;;  %v376_v54 = vpop.f32.mrf.mxu1 }
 0x1c2   :  { %750 = vst [vmem:[%s1321_s6 + $0x10] sm:$0xff] %v734_v51  ;;  %v648_v55 = vadd.f32 %v611_v53, %v394_v10  ;;  %v641_v56 = vadd.f32 %v593_v52, %v376_v54 }
 0x1c4   :  { %v664_v57 = vsub.f32 0.0, %v648_v55  ;;  %v657_v58 = vsub.f32 0.0, %v641_v56  ;;  %v603_v55 = vadd.f32 %v1240_v2, %v602_v41 }
 0x1c6   :  { %v1015_v60 = vpop.eup %1014  ;;  %v692_v62 = vmul.f32 1.442695, %v664_v57  ;;  %v678_v63 = vmul.f32 1.442695, %v657_v58 }
 0x1c7   :  { %v1017_v0 = vpop.eup %1016  ;;  %v704_v1 = vadd.f32 1.0, %v1015_v60  ;;  %v612_v3 = vpop.f32.mrf.mxu3 }
 0x1c8   :  { %v735_v4 = vmin.f32 %v1017_v0, 1.0  ;;  %1018 = vpow2.f32 %v692_v62  ;;  %v613_v5 = vadd.f32 %v1240_v2, %v612_v3  ;;  %v605_v60 = vpop.f32.mrf.mxu2 }
 0x1c9   :  { %1020 = vrcp.f32 %v704_v1  ;;  %v379_v6 = vpop.f32.mrf.mxu1 }
 0x1ca   :  { %751 = vst [vmem:[%s1321_s6 + $0x18] sm:$0xff] %v735_v4  ;;  %1022 = vpow2.f32 %v678_v63  ;;  %v649_v7 = vadd.f32 %v613_v5, %v1245_v19  ;;  %v642_v8 = vadd.f32 %v596_v61, %v379_v6  ;;  %v606_v63 = vadd.f32 %v1240_v2, %v605_v60 }
 0x1cc   :  { %v665_v9 = vsub.f32 0.0, %v649_v7  ;;  %v658_v10 = vsub.f32 0.0, %v642_v8 }
 0x1ce   :  { %v1019_v11 = vpop.eup %1018  ;;  %v694_v12 = vmul.f32 1.442695, %v665_v9  ;;  %v680_v13 = vmul.f32 1.442695, %v658_v10 }
 0x1cf   :  { %v1021_v14 = vpop.eup %1020  ;;  %v712_v15 = vadd.f32 1.0, %v1019_v11  ;;  %v615_v17 = vpop.f32.mrf.mxu3 }
 0x1d0   :  { %v1023_v18 = vpop.eup %1022  ;;  %v736_v20 = vmin.f32 %v1021_v14, 1.0  ;;  %1024 = vpow2.f32 %v694_v12  ;;  %v616_v22 = vadd.f32 %v1240_v2, %v615_v17  ;;  %v607_v12 = vpop.f32.mrf.mxu2 }
 0x1d1   :  { %1026 = vrcp.f32 %v712_v15  ;;  %v705_v23 = vadd.f32 1.0, %v1023_v18  ;;  %v381_v19 = vpop.f32.mrf.mxu1  ;;  %v608_v18 = vadd.f32 %v1240_v2, %v607_v12 }
 0x1d2   :  { %752 = vst [vmem:[%s1321_s6 + $0x20] sm:$0xff] %v736_v20  ;;  %1028 = vpow2.f32 %v680_v13  ;;  %v650_v24 = vadd.f32 %v616_v22, %v1247_v28  ;;  %v643_v25 = vadd.f32 %v598_v21, %v381_v19 }
 0x1d3   :  { %1030 = vrcp.f32 %v705_v23 }
 0x1d4   :  { %v666_v26 = vsub.f32 0.0, %v650_v24  ;;  %v659_v27 = vsub.f32 0.0, %v643_v25 }
 0x1d6   :  { %v1025_v29 = vpop.eup %1024  ;;  %v696_v31 = vmul.f32 1.442695, %v666_v26  ;;  %v682_v32 = vmul.f32 1.442695, %v659_v27 }
 0x1d7   :  { %v1027_v33 = vpop.eup %1026  ;;  %v713_v34 = vadd.f32 1.0, %v1025_v29  ;;  %v617_v35 = vpop.f32.mrf.mxu3 }
 0x1d8   :  { %v1029_v36 = vpop.eup %1028  ;;  %v744_v37 = vmin.f32 %v1027_v33, 1.0  ;;  %1032 = vpow2.f32 %v696_v31  ;;  %v618_v38 = vadd.f32 %v1240_v2, %v617_v35 }
 0x1d9   :  { %v1031_v39 = vpop.eup %1030  ;;  %1034 = vrcp.f32 %v713_v34  ;;  %v706_v28 = vadd.f32 1.0, %v1029_v36  ;;  %v384_v42 = vpop.f32.mrf.mxu1 }
 0x1da   :  { %760 = vst [vmem:[%s1321_s6 + $0x60] sm:$0xff] %v744_v37  ;;  %v737_v43 = vmin.f32 %v1031_v39, 1.0  ;;  %1036 = vpow2.f32 %v682_v32  ;;  %v651_v44 = vadd.f32 %v618_v38, %v1254_v40  ;;  %v644_v45 = vadd.f32 %v601_v30, %v384_v42 }
 0x1db   :  { %1038 = vrcp.f32 %v706_v28 }
 0x1dc   :  { %753 = vst [vmem:[%s1321_s6 + $0x28] sm:$0xff] %v737_v43  ;;  %v667_v46 = vsub.f32 0.0, %v651_v44  ;;  %v660_v47 = vsub.f32 0.0, %v644_v45 }
 0x1de   :  { %v1033_v48 = vpop.eup %1032  ;;  %v698_v49 = vmul.f32 1.442695, %v667_v46  ;;  %v684_v50 = vmul.f32 1.442695, %v660_v47 }
 0x1df   :  { %v1035_v51 = vpop.eup %1034  ;;  %v714_v52 = vadd.f32 1.0, %v1033_v48 }
 0x1e0   :  { %v1037_v53 = vpop.eup %1036  ;;  %v745_v54 = vmin.f32 %v1035_v51, 1.0  ;;  %1040 = vpow2.f32 %v698_v49 }
 0x1e1   :  { %v1039_v56 = vpop.eup %1038  ;;  %1042 = vrcp.f32 %v714_v52  ;;  %v707_v40 = vadd.f32 1.0, %v1037_v53  ;;  %v386_v57 = vpop.f32.mrf.mxu1 }
 0x1e2   :  { %761 = vst [vmem:[%s1321_s6 + $0x68] sm:$0xff] %v745_v54  ;;  %v738_v58 = vmin.f32 %v1039_v56, 1.0  ;;  %1044 = vpow2.f32 %v684_v50  ;;  %v645_v59 = vadd.f32 %v603_v55, %v386_v57 }
 0x1e3   :  { %1046 = vrcp.f32 %v707_v40 }
 0x1e4   :  { %754 = vst [vmem:[%s1321_s6 + $0x30] sm:$0xff] %v738_v58  ;;  %v661_v61 = vsub.f32 0.0, %v645_v59 }
 0x1e6   :  { %v1041_v62 = vpop.eup %1040  ;;  %v686_v0 = vmul.f32 1.442695, %v661_v61 }
 0x1e7   :  { %v1043_v1 = vpop.eup %1042  ;;  %v715_v3 = vadd.f32 1.0, %v1041_v62 }
 0x1e8   :  { %v1045_v4 = vpop.eup %1044  ;;  %v746_v5 = vmin.f32 %v1043_v1, 1.0  ;;  %1048 = vpow2.f32 %v686_v0 }
 0x1e9   :  { %v1047_v6 = vpop.eup %1046  ;;  %1050 = vrcp.f32 %v715_v3  ;;  %v708_v7 = vadd.f32 1.0, %v1045_v4  ;;  %v389_v8 = vpop.f32.mrf.mxu1 }
 0x1ea   :  { %762 = vst [vmem:[%s1321_s6 + $0x70] sm:$0xff] %v746_v5  ;;  %v739_v9 = vmin.f32 %v1047_v6, 1.0  ;;  %v646_v10 = vadd.f32 %v606_v63, %v389_v8 }
 0x1eb   :  { %1052 = vrcp.f32 %v708_v7 }
 0x1ec   :  { %755 = vst [vmem:[%s1321_s6 + $0x38] sm:$0xff] %v739_v9  ;;  %v662_v11 = vsub.f32 0.0, %v646_v10 }
 0x1ee   :  { %v1049_v13 = vpop.eup %1048  ;;  %v688_v14 = vmul.f32 1.442695, %v662_v11 }
 0x1ef   :  { %v1051_v15 = vpop.eup %1050  ;;  %v709_v16 = vadd.f32 1.0, %v1049_v13 }
 0x1f0   :  { %v747_v17 = vmin.f32 %v1051_v15, 1.0  ;;  %1054 = vpow2.f32 %v688_v14 }
 0x1f1   :  { %v1053_v20 = vpop.eup %1052  ;;  %1056 = vrcp.f32 %v709_v16  ;;  %v391_v21 = vpop.f32.mrf.mxu1 }
 0x1f2   :  { %763 = vst [vmem:[%s1321_s6 + $0x78] sm:$0xff] %v747_v17  ;;  %v740_v22 = vmin.f32 %v1053_v20, 1.0  ;;  %v647_v23 = vadd.f32 %v608_v18, %v391_v21 }
 0x1f4   :  { %756 = vst [vmem:[%s1321_s6 + $0x40] sm:$0xff] %v740_v22  ;;  %v663_v19 = vsub.f32 0.0, %v647_v23 }
 0x1f6   :  { %v1055_v24 = vpop.eup %1054  ;;  %v690_v25 = vmul.f32 1.442695, %v663_v19 }
 0x1f7   :  { %v1057_v26 = vpop.eup %1056  ;;  %v710_v27 = vadd.f32 1.0, %v1055_v24 }
 0x1f8   :  { %v741_v2 = vmin.f32 %v1057_v26, 1.0  ;;  %1058 = vpow2.f32 %v690_v25 }
 0x1f9   :  { %1060 = vrcp.f32 %v710_v27 }
 0x1fa   :  { %757 = vst [vmem:[%s1321_s6 + $0x48] sm:$0xff] %v741_v2 }
 0x1fe   :  { %v1059_v29 = vpop.eup %1058 }
 0x1ff   :  { %v1061_v30 = vpop.eup %1060  ;;  %v711_v31 = vadd.f32 1.0, %v1059_v29 }
 0x200   :  { %v742_v32 = vmin.f32 %v1061_v30, 1.0 }
 0x201   :  { %1062 = vrcp.f32 %v711_v31 }
 0x202   :  { %758 = vst [vmem:[%s1321_s6 + $0x50] sm:$0xff] %v742_v32 }
 0x207   :  { %v1063_v33 = vpop.eup %1062 }
 0x208   :  { %v743_v34 = vmin.f32 %v1063_v33, 1.0 }
 0x20a   :  { %759 = vst [vmem:[%s1321_s6 + $0x58] sm:$0xff] %v743_v34 }
 0x20b   :  { %768 = vsyncpa [#allocation4], 1 }
 0x20c   :  { %769 = vsyncpa [#allocation6], 1 }

</bundles_post_ra>
